<compile_context>
chip_gen: v5e
topology: v5e:2x2
jax: 0.10.0
libtpu: 0.0.40
codegen_flags: <defaults>
</compile_context>

<pallas_src>
import functools

import jax
import jax.numpy as jnp
import numpy as np
from jax.experimental import pallas as pl
from jax.experimental.pallas import tpu as pltpu


def _round_up(x, m):
    return (x + m - 1) // m * m


def _cross_attn_kernel(tgt_ref, qpos_ref, mem_ref, pos_ref,
                       wq_ref, wk_ref, wv_ref,
                       bq_ref, bk_ref, bv_ref,
                       wo_ref, bo_ref,
                       gamma_ref, beta_ref,
                       out_ref,
                       q_scr, m_scr, l_scr, acc_scr,
                       *, nhead, head_dim, eps, s_real, needs_mask,
                       compute_dtype, softmax_dtype):
    si = pl.program_id(2)
    n_s = pl.num_programs(2)
    tile_l = tgt_ref.shape[1]
    tile_s = mem_ref.shape[1]
    e = nhead * head_dim
    scale = float(1.0 / np.sqrt(head_dim))

    # ---- first S tile: reset accumulators, project + scale Q once per (b, L-tile) ----
    @pl.when(si == 0)
    def _init():
        m_scr[...] = jnp.full(m_scr.shape, -jnp.inf, jnp.float32)
        l_scr[...] = jnp.zeros(l_scr.shape, jnp.float32)
        acc_scr[...] = jnp.zeros(acc_scr.shape, jnp.float32)
        q_in = (tgt_ref[0].astype(jnp.float32)
                + qpos_ref[0].astype(jnp.float32)).astype(compute_dtype)
        q = jnp.dot(q_in, wq_ref[...],
                    preferred_element_type=jnp.float32) + bq_ref[...]
        q = q * scale                                             # fold 1/sqrt(hd) into q
        qh = jnp.transpose(q.reshape(tile_l, nhead, head_dim), (1, 0, 2))   # (H, TL, hd)
        q_scr[...] = qh.astype(compute_dtype)

    # ---- K / V projections for this S tile (narrow MXU inputs, f32 accumulation) ----
    k_in = (mem_ref[0].astype(jnp.float32)
            + pos_ref[0].astype(jnp.float32)).astype(compute_dtype)
    k = jnp.dot(k_in, wk_ref[...], preferred_element_type=jnp.float32) + bk_ref[...]
    v = jnp.dot(mem_ref[0].astype(compute_dtype), wv_ref[...],
                preferred_element_type=jnp.float32) + bv_ref[...]
    kh = jnp.transpose(k.reshape(tile_s, nhead, head_dim), (1, 0, 2)).astype(compute_dtype)
    vh = jnp.transpose(v.reshape(tile_s, nhead, head_dim), (1, 0, 2)).astype(compute_dtype)

    # ---- attention scores, batched over heads on the MXU ----
    s = jnp.einsum("hld,htd->hlt", q_scr[...], kh,
                   preferred_element_type=jnp.float32)            # (H, TL, TS) f32

    def _softmax_update(scores):
        m_prev = m_scr[...]
        m_new = jnp.maximum(m_prev, jnp.max(scores, axis=-1, keepdims=True))
        alpha = jnp.exp(m_prev - m_new)                           # (H, TL, 1) f32
        # masking/subtraction stay f32; exp runs in softmax_dtype (bf16 on perf path)
        p = jnp.exp((scores - m_new).astype(softmax_dtype))
        l_scr[...] = alpha * l_scr[...] + jnp.sum(p, axis=-1, keepdims=True,
                                                  dtype=jnp.float32)
        pv = jnp.einsum("hlt,htd->hld", p, vh,
                        preferred_element_type=jnp.float32)       # (H, TL, hd) f32
        acc_scr[...] = alpha * acc_scr[...] + pv
        m_scr[...] = m_new

    if needs_mask:
        # Only the final S tile contains zero-padded memory rows: gate the masking
        # so full tiles never pay the compare+select over (H, TL, TS).
        @pl.when(si < n_s - 1)
        def _full_tile():
            _softmax_update(s)

        @pl.when(si == n_s - 1)
        def _tail_tile():
            col = jax.lax.broadcasted_iota(jnp.int32, (1, 1, tile_s), 2) + si * tile_s
            _softmax_update(jnp.where(col < s_real, s, -1e30))    # finite, f32 mask value
    else:
        _softmax_update(s)

    # ---- last S tile: normalize, output projection, residual, LayerNorm ----
    @pl.when(si == n_s - 1)
    def _finalize():
        inv_l = pl.reciprocal(l_scr[...], approx=False)           # exact; once per tile
        o = acc_scr[...] * inv_l                                  # (H, TL, hd) f32
        o = jnp.transpose(o, (1, 0, 2)).reshape(tile_l, e)        # (TL, E)
        tgt2 = jnp.dot(o.astype(compute_dtype), wo_ref[...],
                       preferred_element_type=jnp.float32) + bo_ref[...]
        res = tgt_ref[0].astype(jnp.float32) + tgt2               # f32 residual path
        mean = jnp.mean(res, axis=-1, keepdims=True)
        cent = res - mean
        var = jnp.mean(cent * cent, axis=-1, keepdims=True)
        normed = cent * jax.lax.rsqrt(var + eps)
        out_ref[0] = (normed * gamma_ref[...] + beta_ref[...]).astype(out_ref.dtype)


def _vmem_capacity_bytes():
    try:
        info = pltpu.get_tpu_info()
        for name in ("vmem_capacity_bytes", "vmem_size_bytes", "vmem_bytes"):
            cap = getattr(info, name, None)
            if cap:
                return int(cap)
    except Exception:
        pass
    return 64 * 2**20          # conservative (v7x-sized) fallback


def _pick_tile_l(l, granule, tile_l_max):
    tile_l_max = max(granule, tile_l_max // granule * granule)
    r = _round_up(l, granule)
    if r >= tile_l_max:
        return tile_l_max
    if l > 64:
        # Prefer a full 128-row MXU tile (e.g. Mask2Former L=100 -> 128).
        return min(_round_up(l, 128), tile_l_max)
    return r


def _pick_tile_s(s, granule, tile_s_max):
    tile_s_max = max(granule, tile_s_max // granule * granule)
    r = _round_up(s, granule)
    if r <= tile_s_max:
        return r
    # Multi-tile: prefer a tile that divides S exactly (no pad pass, no tail mask).
    lo = max(granule, min(256, tile_s_max))
    t = tile_s_max
    while t >= lo:
        if s % t == 0:
            return t
        t -= granule
    # Fall back to an MXU-friendly tile; the ragged tail is zero-padded + masked.
    if tile_s_max >= 256:
        return tile_s_max // 256 * 256
    return tile_s_max


def cross_attention_layer_batched(tgt, memory, query_pos, pos, params, *, nhead,
                                  compute_dtype=jnp.bfloat16, softmax_dtype=None,
                                  tile_l_max=128, tile_s_max=None, eps=1e-5):
    """Batch-major entry point: tgt/query_pos (N, L, E), memory/pos (N, S, E).

    No wrapper-side transposes or dtype-cast passes; inputs are streamed in the
    caller's dtype and zero-padded only when no tile size divides the sequence.
    """
    N, L, E = tgt.shape
    S = memory.shape[1]
    assert E % nhead == 0
    head_dim = E // nhead
    if softmax_dtype is None:
        softmax_dtype = compute_dtype

    vmem_cap = _vmem_capacity_bytes()
    if tile_s_max is None:
        # 128 MiB parts (v5e/v6e) can afford larger S tiles than v7x (64 MiB).
        tile_s_max = 1024 if vmem_cap >= 96 * 2**20 else 512

    streamed = (tgt, query_pos, memory, pos)
    granule = 8 if all(jnp.dtype(a.dtype).itemsize >= 4 for a in streamed) else 16

    tile_l = _pick_tile_l(L, granule, tile_l_max)
    tile_s = _pick_tile_s(S, granule, tile_s_max)
    l_pad = _round_up(L, tile_l)
    s_pad = _round_up(S, tile_s)
    n_l = l_pad // tile_l
    n_s = s_pad // tile_s
    needs_mask = s_pad != S

    tgt_b = tgt.astype(jnp.float32)            # residual + LayerNorm path stays f32
    qpos_b, mem_b, pos_b = query_pos, memory, pos
    if l_pad != L:
        tgt_b = jnp.pad(tgt_b, ((0, 0), (0, l_pad - L), (0, 0)))
        qpos_b = jnp.pad(qpos_b, ((0, 0), (0, l_pad - L), (0, 0)))
    if s_pad != S:
        mem_b = jnp.pad(mem_b, ((0, 0), (0, s_pad - S), (0, 0)))
        pos_b = jnp.pad(pos_b, ((0, 0), (0, s_pad - S), (0, 0)))

    # Parameters (weights pre-transposed to W^T; MXU weights in compute_dtype).
    in_w = params["in_proj_weight"].astype(jnp.float32)
    in_b = params["in_proj_bias"].astype(jnp.float32)
    wq_t = in_w[0:E, :].T.astype(compute_dtype)
    wk_t = in_w[E:2 * E, :].T.astype(compute_dtype)
    wv_t = in_w[2 * E:3 * E, :].T.astype(compute_dtype)
    bq = in_b[0:E].reshape(1, E)
    bk = in_b[E:2 * E].reshape(1, E)
    bv = in_b[2 * E:3 * E].reshape(1, E)
    wo_t = params["out_proj_weight"].astype(jnp.float32).T.astype(compute_dtype)
    bo = params["out_proj_bias"].astype(jnp.float32).reshape(1, E)
    gamma = params["norm_weight"].astype(jnp.float32).reshape(1, E)
    beta = params["norm_bias"].astype(jnp.float32).reshape(1, E)

    kernel = functools.partial(
        _cross_attn_kernel, nhead=nhead, head_dim=head_dim, eps=eps, s_real=S,
        needs_mask=needs_mask, compute_dtype=compute_dtype, softmax_dtype=softmax_dtype)

    l_spec = pl.BlockSpec((1, tile_l, E), lambda b, li, si: (b, li, 0))
    s_spec = pl.BlockSpec((1, tile_s, E), lambda b, li, si: (b, si, 0))
    mat_spec = pl.BlockSpec((E, E), lambda b, li, si: (0, 0))
    vec_spec = pl.BlockSpec((1, E), lambda b, li, si: (0, 0))

    # VMEM budget estimate (double-buffered streamed blocks + weights + scratch + temps),
    # capped by the queried on-chip capacity (v7x-aware).
    cbytes = jnp.dtype(compute_dtype).itemsize
    smbytes = jnp.dtype(softmax_dtype).itemsize
    stream_bytes = sum(jnp.dtype(a.dtype).itemsize for a in (mem_b, pos_b))
    lstream_bytes = sum(jnp.dtype(a.dtype).itemsize for a in (tgt_b, qpos_b))
    bytes_blocks = (2 * tile_l * E * (lstream_bytes + 4)
                    + 2 * tile_s * E * stream_bytes)
    bytes_weights = 2 * (4 * E * E * cbytes + 6 * E * 4)
    bytes_scratch = nhead * tile_l * (head_dim * (cbytes + 4) + 8)
    bytes_temps = nhead * tile_l * tile_s * (4 + 4 + smbytes)
    vmem_limit = int(min(int(0.9 * vmem_cap),
                         max(48 * 2**20,
                             3 * (bytes_blocks + bytes_weights
                                  + bytes_scratch + bytes_temps))))

    flops = int(4 * N * l_pad * E * E                 # Q + output projections
                + 4 * N * n_l * s_pad * E * E         # K + V projections (per L-tile)
                + 4 * N * l_pad * s_pad * E)          # QK^T + PV
    transcendentals = int(N * nhead * l_pad * s_pad)
    bytes_accessed = int(N * l_pad * E * (lstream_bytes + 4)
                         + N * n_l * s_pad * E * stream_bytes
                         + 4 * E * E * cbytes + 6 * E * 4)

    out = pl.pallas_call(
        kernel,
        out_shape=jax.ShapeDtypeStruct((N, l_pad, E), tgt.dtype),
        grid_spec=pltpu.PrefetchScalarGridSpec(
            num_scalar_prefetch=0,
            grid=(N, n_l, n_s),
            in_specs=[l_spec, l_spec, s_spec, s_spec,
                      mat_spec, mat_spec, mat_spec,
                      vec_spec, vec_spec, vec_spec,
                      mat_spec, vec_spec,
                      vec_spec, vec_spec],
            out_specs=pl.BlockSpec((1, tile_l, E), lambda b, li, si: (b, li, 0)),
            scratch_shapes=[
                pltpu.VMEM((nhead, tile_l, head_dim), compute_dtype),   # cached scaled Q
                pltpu.VMEM((nhead, tile_l, 1), jnp.float32),            # running max
                pltpu.VMEM((nhead, tile_l, 1), jnp.float32),            # running denom
                pltpu.VMEM((nhead, tile_l, head_dim), jnp.float32),     # unnormalized acc
            ]),
        compiler_params=pltpu.CompilerParams(
            dimension_semantics=("parallel", "parallel", "arbitrary"),
            vmem_limit_bytes=vmem_limit),
        cost_estimate=pl.CostEstimate(flops=flops,
                                      transcendentals=transcendentals,
                                      bytes_accessed=bytes_accessed),
    )(tgt_b, qpos_b, mem_b, pos_b,
      wq_t, wk_t, wv_t, bq, bk, bv,
      wo_t, bo, gamma, beta)

    if l_pad != L:
        out = out[:, :L, :]
    return out


def cross_attention_layer(tgt, memory, query_pos, pos, params, *, nhead, **kw):
    """PyTorch nn.MultiheadAttention convention: tgt/query_pos (L, N, E), memory/pos (S, N, E).

    The transposes below are layout plumbing only; callers with batch-major
    activations should use cross_attention_layer_batched directly (zero extra
    HBM passes).
    """
    out = cross_attention_layer_batched(
        jnp.transpose(tgt, (1, 0, 2)), jnp.transpose(memory, (1, 0, 2)),
        jnp.transpose(query_pos, (1, 0, 2)), jnp.transpose(pos, (1, 0, 2)),
        params, nhead=nhead, **kw)
    return jnp.transpose(out, (1, 0, 2))               # back to (L, N, E)


def _reference(tgt, memory, query_pos, pos, params, *, nhead):
    """Pure-JAX f32 reference matching nn.MultiheadAttention + residual + LayerNorm."""
    L, N, E = tgt.shape
    S = memory.shape[0]
    hd = E // nhead
    in_w = params["in_proj_weight"]
    in_b = params["in_proj_bias"]
    q = (tgt + query_pos) @ in_w[0:E].T + in_b[0:E]
    k = (memory + pos) @ in_w[E:2 * E].T + in_b[E:2 * E]
    v = memory @ in_w[2 * E:3 * E].T + in_b[2 * E:3 * E]

    def split(x, T):
        return jnp.transpose(x.reshape(T, N, nhead, hd), (1, 2, 0, 3))

    qh, kh, vh = split(q, L), split(k, S), split(v, S)
    scores = jnp.einsum("bhld,bhsd->bhls", qh, kh) / np.sqrt(hd)
    p = jax.nn.softmax(scores, axis=-1)
    o = jnp.einsum("bhls,bhsd->bhld", p, vh)
    o = jnp.transpose(o, (2, 0, 1, 3)).reshape(L, N, E)
    tgt2 = o @ params["out_proj_weight"].T + params["out_proj_bias"]
    res = tgt + tgt2
    mean = jnp.mean(res, axis=-1, keepdims=True)
    var = jnp.mean((res - mean) ** 2, axis=-1, keepdims=True)
    return (res - mean) / jnp.sqrt(var + 1e-5) * params["norm_weight"] + params["norm_bias"]


def _xavier_uniform(key, shape):
    fan_out, fan_in = shape[0], shape[1]
    bound = np.sqrt(6.0 / (fan_in + fan_out))
    return jax.random.uniform(key, shape, jnp.float32, -bound, bound)


if __name__ == "__main__":
    d_model, nhead = 32, 4
    L, S, N = 8, 40, 2          # num queries, memory length (ragged tail), batch

    key = jax.random.PRNGKey(0)
    keys = jax.random.split(key, 10)

    params = {
        "in_proj_weight": _xavier_uniform(keys[0], (3 * d_model, d_model)),
        "in_proj_bias": 0.1 * jax.random.normal(keys[6], (3 * d_model,), jnp.float32),
        "out_proj_weight": _xavier_uniform(keys[1], (d_model, d_model)),
        "out_proj_bias": 0.1 * jax.random.normal(keys[7], (d_model,), jnp.float32),
        "norm_weight": 1.0 + 0.1 * jax.random.normal(keys[8], (d_model,), jnp.float32),
        "norm_bias": 0.1 * jax.random.normal(keys[9], (d_model,), jnp.float32),
    }

    tgt = jax.random.normal(keys[2], (L, N, d_model), jnp.float32)
    memory = jax.random.normal(keys[3], (S, N, d_model), jnp.float32)
    query_pos = jax.random.normal(keys[4], (L, N, d_model), jnp.float32)
    pos = jax.random.normal(keys[5], (S, N, d_model), jnp.float32)

    ref = _reference(tgt, memory, query_pos, pos, params, nhead=nhead)

    # Structural check: f32 MXU/softmax path, small tile_s_max to exercise the
    # multi-tile online softmax and the masked ragged-tail S tile.
    out_f32 = cross_attention_layer(tgt, memory, query_pos, pos, params,
                                    nhead=nhead, compute_dtype=jnp.float32,
                                    tile_s_max=16)
    out_f32 = jax.block_until_ready(out_f32)
    np.testing.assert_allclose(np.asarray(out_f32), np.asarray(ref),
                               atol=2e-2, rtol=2e-2)

    # Performance path: bf16 MXU inputs + bf16 exp with f32 accumulation.
    out_bf16 = cross_attention_layer(tgt, memory, query_pos, pos, params,
                                     nhead=nhead, tile_s_max=16)
    out_bf16 = jax.block_until_ready(out_bf16)
    np.testing.assert_allclose(np.asarray(out_bf16), np.asarray(ref),
                               atol=1.5e-1, rtol=1e-1)

    # Default tile selection (single S tile, no tail mask) via the batch-major
    # entry point (no wrapper transposes at all).
    out_def = cross_attention_layer_batched(
        jnp.transpose(tgt, (1, 0, 2)), jnp.transpose(memory, (1, 0, 2)),
        jnp.transpose(query_pos, (1, 0, 2)), jnp.transpose(pos, (1, 0, 2)),
        params, nhead=nhead, compute_dtype=jnp.float32)
    out_def = jax.block_until_ready(out_def)
    np.testing.assert_allclose(np.asarray(jnp.transpose(out_def, (1, 0, 2))),
                               np.asarray(ref), atol=2e-2, rtol=2e-2)

    print("KERNEL_OK")
</pallas_src>

<mosaic_0001>
module attributes {stable_mosaic.version = 11 : i64} {
  func.func @_cross_attn_kernel(%arg0: i32, %arg1: i32, %arg2: i32, %arg3: memref<1x8x32xf32, #tpu.memory_space<vmem>>, %arg4: memref<1x8x32xf32, #tpu.memory_space<vmem>>, %arg5: memref<1x16x32xf32, #tpu.memory_space<vmem>>, %arg6: memref<1x16x32xf32, #tpu.memory_space<vmem>>, %arg7: memref<32x32xf32, #tpu.memory_space<vmem>>, %arg8: memref<32x32xf32, #tpu.memory_space<vmem>>, %arg9: memref<32x32xf32, #tpu.memory_space<vmem>>, %arg10: memref<1x32xf32, #tpu.memory_space<vmem>>, %arg11: memref<1x32xf32, #tpu.memory_space<vmem>>, %arg12: memref<1x32xf32, #tpu.memory_space<vmem>>, %arg13: memref<32x32xf32, #tpu.memory_space<vmem>>, %arg14: memref<1x32xf32, #tpu.memory_space<vmem>>, %arg15: memref<1x32xf32, #tpu.memory_space<vmem>>, %arg16: memref<1x32xf32, #tpu.memory_space<vmem>>, %arg17: memref<1x8x32xf32, #tpu.memory_space<vmem>>, %arg18: memref<4x8x8xf32, #tpu.memory_space<vmem>>, %arg19: memref<4x8x1xf32, #tpu.memory_space<vmem>>, %arg20: memref<4x8x1xf32, #tpu.memory_space<vmem>>, %arg21: memref<4x8x8xf32, #tpu.memory_space<vmem>>) attributes {dimension_semantics = [#tpu.dimension_semantics<parallel>, #tpu.dimension_semantics<parallel>, #tpu.dimension_semantics<arbitrary>], iteration_bounds = array<i64: 2, 1, 3>, scalar_prefetch = 0 : i64, scratch_operands = 4 : i64, tpu.core_type = #tpu.core_type<tc>, window_params = [{transform_indices = @transform_0, window_bounds = array<i64: 1, 8, 32>}, {transform_indices = @transform_1, window_bounds = array<i64: 1, 8, 32>}, {transform_indices = @transform_2, window_bounds = array<i64: 1, 16, 32>}, {transform_indices = @transform_3, window_bounds = array<i64: 1, 16, 32>}, {pipeline_mode = #tpu.pipeline_mode<synchronous>, transform_indices = @transform_4, window_bounds = array<i64: 32, 32>}, {pipeline_mode = #tpu.pipeline_mode<synchronous>, transform_indices = @transform_5, window_bounds = array<i64: 32, 32>}, {pipeline_mode = #tpu.pipeline_mode<synchronous>, transform_indices = @transform_6, window_bounds = array<i64: 32, 32>}, {pipeline_mode = #tpu.pipeline_mode<synchronous>, transform_indices = @transform_7, window_bounds = array<i64: 1, 32>}, {pipeline_mode = #tpu.pipeline_mode<synchronous>, transform_indices = @transform_8, window_bounds = array<i64: 1, 32>}, {pipeline_mode = #tpu.pipeline_mode<synchronous>, transform_indices = @transform_9, window_bounds = array<i64: 1, 32>}, {pipeline_mode = #tpu.pipeline_mode<synchronous>, transform_indices = @transform_10, window_bounds = array<i64: 32, 32>}, {pipeline_mode = #tpu.pipeline_mode<synchronous>, transform_indices = @transform_11, window_bounds = array<i64: 1, 32>}, {pipeline_mode = #tpu.pipeline_mode<synchronous>, transform_indices = @transform_12, window_bounds = array<i64: 1, 32>}, {pipeline_mode = #tpu.pipeline_mode<synchronous>, transform_indices = @transform_13, window_bounds = array<i64: 1, 32>}, {transform_indices = @transform_14, window_bounds = array<i64: 1, 8, 32>}]} {
    %c0_i32 = arith.constant 0 : i32
    %0 = arith.cmpi eq, %arg2, %c0_i32 : i32
    %1 = arith.extui %0 : i1 to i32
    %c0_i32_0 = arith.constant 0 : i32
    %2 = arith.cmpi ne, %1, %c0_i32_0 : i32
    scf.if %2 {
      %cst_27 = arith.constant 0xFF800000 : f32
      %35 = vector.broadcast %cst_27 : f32 to vector<4x8x1xf32>
      %c0_28 = arith.constant 0 : index
      %c0_29 = arith.constant 0 : index
      %c0_30 = arith.constant 0 : index
      %36 = vector.load %arg19[%c0_28, %c0_29, %c0_30] : memref<4x8x1xf32, #tpu.memory_space<vmem>>, vector<4x8x1xf32>
      tpu.vector_store %arg19[%c0_28, %c0_29, %c0_30], %35 {strides = array<i32>} : memref<4x8x1xf32, #tpu.memory_space<vmem>>, vector<4x8x1xf32>,
      %cst_31 = arith.constant 0.000000e+00 : f32
      %37 = vector.broadcast %cst_31 : f32 to vector<4x8x1xf32>
      %c0_32 = arith.constant 0 : index
      %c0_33 = arith.constant 0 : index
      %c0_34 = arith.constant 0 : index
      %38 = vector.load %arg20[%c0_32, %c0_33, %c0_34] : memref<4x8x1xf32, #tpu.memory_space<vmem>>, vector<4x8x1xf32>
      tpu.vector_store %arg20[%c0_32, %c0_33, %c0_34], %37 {strides = array<i32>} : memref<4x8x1xf32, #tpu.memory_space<vmem>>, vector<4x8x1xf32>,
      %cst_35 = arith.constant 0.000000e+00 : f32
      %39 = vector.broadcast %cst_35 : f32 to vector<4x8x8xf32>
      %c0_36 = arith.constant 0 : index
      %c0_37 = arith.constant 0 : index
      %c0_38 = arith.constant 0 : index
      %40 = vector.load %arg21[%c0_36, %c0_37, %c0_38] : memref<4x8x8xf32, #tpu.memory_space<vmem>>, vector<4x8x8xf32>
      tpu.vector_store %arg21[%c0_36, %c0_37, %c0_38], %39 {strides = array<i32>} : memref<4x8x8xf32, #tpu.memory_space<vmem>>, vector<4x8x8xf32>,
      %c0_39 = arith.constant 0 : index
      %c0_40 = arith.constant 0 : index
      %c0_41 = arith.constant 0 : index
      %41 = vector.load %arg3[%c0_39, %c0_40, %c0_41] : memref<1x8x32xf32, #tpu.memory_space<vmem>>, vector<1x8x32xf32>
      %42 = vector.shape_cast %41 : vector<1x8x32xf32> to vector<8x32xf32>
      %c0_42 = arith.constant 0 : index
      %c0_43 = arith.constant 0 : index
      %c0_44 = arith.constant 0 : index
      %43 = vector.load %arg4[%c0_42, %c0_43, %c0_44] : memref<1x8x32xf32, #tpu.memory_space<vmem>>, vector<1x8x32xf32>
      %44 = vector.shape_cast %43 : vector<1x8x32xf32> to vector<8x32xf32>
      %45 = arith.addf %42, %44 : vector<8x32xf32>
      %c0_45 = arith.constant 0 : index
      %c0_46 = arith.constant 0 : index
      %46 = vector.load %arg7[%c0_45, %c0_46] : memref<32x32xf32, #tpu.memory_space<vmem>>, vector<32x32xf32>
      %cst_47 = arith.constant dense<0.000000e+00> : vector<8x32xf32>
      %47 = tpu.matmul %45, %46, %cst_47 {dimension_numbers = #tpu.dot_dimension_numbers<[1], [0], [0], [1], [0, 0, 1, 1], [], []>} : vector<8x32xf32>, vector<32x32xf32>, vector<8x32xf32> -> vector<8x32xf32>
      %c0_48 = arith.constant 0 : index
      %c0_49 = arith.constant 0 : index
      %48 = vector.load %arg10[%c0_48, %c0_49] : memref<1x32xf32, #tpu.memory_space<vmem>>, vector<1x32xf32>
      %49 = vector.broadcast %48 : vector<1x32xf32> to vector<8x32xf32>
      %50 = arith.addf %47, %49 : vector<8x32xf32>
      %cst_50 = arith.constant 0.353553385 : f32
      %51 = vector.broadcast %cst_50 : f32 to vector<8x32xf32>
      %52 = arith.mulf %50, %51 : vector<8x32xf32>
      %53 = vector.shape_cast %52 : vector<8x32xf32> to vector<8x4x8xf32>
      %54 = tpu.transpose %53, [1, 0, 2] : vector<8x4x8xf32> -> vector<4x8x8xf32>
      %c0_51 = arith.constant 0 : index
      %c0_52 = arith.constant 0 : index
      %c0_53 = arith.constant 0 : index
      %55 = vector.load %arg18[%c0_51, %c0_52, %c0_53] : memref<4x8x8xf32, #tpu.memory_space<vmem>>, vector<4x8x8xf32>
      tpu.vector_store %arg18[%c0_51, %c0_52, %c0_53], %54 {strides = array<i32>} : memref<4x8x8xf32, #tpu.memory_space<vmem>>, vector<4x8x8xf32>,
    } else {
    }
    %c0 = arith.constant 0 : index
    %c0_1 = arith.constant 0 : index
    %c0_2 = arith.constant 0 : index
    %3 = vector.load %arg5[%c0, %c0_1, %c0_2] : memref<1x16x32xf32, #tpu.memory_space<vmem>>, vector<1x16x32xf32>
    %4 = vector.shape_cast %3 : vector<1x16x32xf32> to vector<16x32xf32>
    %c0_3 = arith.constant 0 : index
    %c0_4 = arith.constant 0 : index
    %c0_5 = arith.constant 0 : index
    %5 = vector.load %arg6[%c0_3, %c0_4, %c0_5] : memref<1x16x32xf32, #tpu.memory_space<vmem>>, vector<1x16x32xf32>
    %6 = vector.shape_cast %5 : vector<1x16x32xf32> to vector<16x32xf32>
    %7 = arith.addf %4, %6 : vector<16x32xf32>
    %c0_6 = arith.constant 0 : index
    %c0_7 = arith.constant 0 : index
    %8 = vector.load %arg8[%c0_6, %c0_7] : memref<32x32xf32, #tpu.memory_space<vmem>>, vector<32x32xf32>
    %cst = arith.constant dense<0.000000e+00> : vector<16x32xf32>
    %9 = tpu.matmul %7, %8, %cst {dimension_numbers = #tpu.dot_dimension_numbers<[1], [0], [0], [1], [0, 0, 1, 1], [], []>} : vector<16x32xf32>, vector<32x32xf32>, vector<16x32xf32> -> vector<16x32xf32>
    %c0_8 = arith.constant 0 : index
    %c0_9 = arith.constant 0 : index
    %10 = vector.load %arg11[%c0_8, %c0_9] : memref<1x32xf32, #tpu.memory_space<vmem>>, vector<1x32xf32>
    %11 = vector.broadcast %10 : vector<1x32xf32> to vector<16x32xf32>
    %12 = arith.addf %9, %11 : vector<16x32xf32>
    %c0_10 = arith.constant 0 : index
    %c0_11 = arith.constant 0 : index
    %c0_12 = arith.constant 0 : index
    %13 = vector.load %arg5[%c0_10, %c0_11, %c0_12] : memref<1x16x32xf32, #tpu.memory_space<vmem>>, vector<1x16x32xf32>
    %14 = vector.shape_cast %13 : vector<1x16x32xf32> to vector<16x32xf32>
    %c0_13 = arith.constant 0 : index
    %c0_14 = arith.constant 0 : index
    %15 = vector.load %arg9[%c0_13, %c0_14] : memref<32x32xf32, #tpu.memory_space<vmem>>, vector<32x32xf32>
    %cst_15 = arith.constant dense<0.000000e+00> : vector<16x32xf32>
    %16 = tpu.matmul %14, %15, %cst_15 {dimension_numbers = #tpu.dot_dimension_numbers<[1], [0], [0], [1], [0, 0, 1, 1], [], []>} : vector<16x32xf32>, vector<32x32xf32>, vector<16x32xf32> -> vector<16x32xf32>
    %c0_16 = arith.constant 0 : index
    %c0_17 = arith.constant 0 : index
    %17 = vector.load %arg12[%c0_16, %c0_17] : memref<1x32xf32, #tpu.memory_space<vmem>>, vector<1x32xf32>
    %18 = vector.broadcast %17 : vector<1x32xf32> to vector<16x32xf32>
    %19 = arith.addf %16, %18 : vector<16x32xf32>
    %20 = vector.shape_cast %12 : vector<16x32xf32> to vector<16x4x8xf32>
    %21 = tpu.transpose %20, [1, 0, 2] : vector<16x4x8xf32> -> vector<4x16x8xf32>
    %22 = vector.shape_cast %19 : vector<16x32xf32> to vector<16x4x8xf32>
    %23 = tpu.transpose %22, [1, 0, 2] : vector<16x4x8xf32> -> vector<4x16x8xf32>
    %c0_18 = arith.constant 0 : index
    %c0_19 = arith.constant 0 : index
    %c0_20 = arith.constant 0 : index
    %24 = vector.load %arg18[%c0_18, %c0_19, %c0_20] : memref<4x8x8xf32, #tpu.memory_space<vmem>>, vector<4x8x8xf32>
    "tpu.trace_start"() <{level = 10 : i32, message = "hld,htd->hlt"}> : () -> ()
    %cst_21 = arith.constant dense<0.000000e+00> : vector<4x8x16xf32>
    %25 = tpu.matmul %24, %21, %cst_21 {dimension_numbers = #tpu.dot_dimension_numbers<[2], [2], [1], [1], [0, 0, 0, 1, 1, 1], [0], [0]>} : vector<4x8x8xf32>, vector<4x16x8xf32>, vector<4x8x16xf32> -> vector<4x8x16xf32>
    %c2_i32 = arith.constant 2 : i32
    "tpu.trace_stop"() : () -> ()
    %26 = arith.cmpi slt, %arg2, %c2_i32 : i32
    %27 = arith.extui %26 : i1 to i32
    %c0_i32_22 = arith.constant 0 : i32
    %28 = arith.cmpi ne, %27, %c0_i32_22 : i32
    scf.if %28 {
      %c0_27 = arith.constant 0 : index
      %c0_28 = arith.constant 0 : index
      %c0_29 = arith.constant 0 : index
      %35 = vector.load %arg19[%c0_27, %c0_28, %c0_29] : memref<4x8x1xf32, #tpu.memory_space<vmem>>, vector<4x8x1xf32>
      %cst_30 = arith.constant dense<0xFF800000> : vector<4x8xf32>
      %36 = vector.multi_reduction <maximumf>, %25, %cst_30 [2] : vector<4x8x16xf32> to vector<4x8xf32>
      %37 = vector.shape_cast %36 : vector<4x8xf32> to vector<4x8x1xf32>
      %38 = arith.maximumf %35, %37 : vector<4x8x1xf32>
      %39 = arith.subf %35, %38 : vector<4x8x1xf32>
      %40 = math.exp %39 : vector<4x8x1xf32>
      %41 = vector.broadcast %38 : vector<4x8x1xf32> to vector<4x8x16xf32>
      %42 = arith.subf %25, %41 : vector<4x8x16xf32>
      %43 = math.exp %42 : vector<4x8x16xf32>
      %c0_31 = arith.constant 0 : index
      %c0_32 = arith.constant 0 : index
      %c0_33 = arith.constant 0 : index
      %44 = vector.load %arg20[%c0_31, %c0_32, %c0_33] : memref<4x8x1xf32, #tpu.memory_space<vmem>>, vector<4x8x1xf32>
      %45 = arith.mulf %40, %44 : vector<4x8x1xf32>
      %cst_34 = arith.constant dense<0.000000e+00> : vector<4x8xf32>
      %46 = vector.multi_reduction <add>, %43, %cst_34 [2] : vector<4x8x16xf32> to vector<4x8xf32>
      %47 = vector.shape_cast %46 : vector<4x8xf32> to vector<4x8x1xf32>
      %48 = arith.addf %45, %47 : vector<4x8x1xf32>
      %c0_35 = arith.constant 0 : index
      %c0_36 = arith.constant 0 : index
      %c0_37 = arith.constant 0 : index
      %49 = vector.load %arg20[%c0_35, %c0_36, %c0_37] : memref<4x8x1xf32, #tpu.memory_space<vmem>>, vector<4x8x1xf32>
      tpu.vector_store %arg20[%c0_35, %c0_36, %c0_37], %48 {strides = array<i32>} : memref<4x8x1xf32, #tpu.memory_space<vmem>>, vector<4x8x1xf32>,
      "tpu.trace_start"() <{level = 10 : i32, message = "hlt,htd->hld"}> : () -> ()
      %cst_38 = arith.constant dense<0.000000e+00> : vector<4x8x8xf32>
      %50 = tpu.matmul %43, %23, %cst_38 {dimension_numbers = #tpu.dot_dimension_numbers<[2], [1], [1], [2], [0, 0, 0, 1, 1, 2], [0], [0]>} : vector<4x8x16xf32>, vector<4x16x8xf32>, vector<4x8x8xf32> -> vector<4x8x8xf32>
      "tpu.trace_stop"() : () -> ()
      %c0_39 = arith.constant 0 : index
      %c0_40 = arith.constant 0 : index
      %c0_41 = arith.constant 0 : index
      %51 = vector.load %arg21[%c0_39, %c0_40, %c0_41] : memref<4x8x8xf32, #tpu.memory_space<vmem>>, vector<4x8x8xf32>
      %52 = vector.broadcast %40 : vector<4x8x1xf32> to vector<4x8x8xf32>
      %53 = arith.mulf %52, %51 : vector<4x8x8xf32>
      %54 = arith.addf %53, %50 : vector<4x8x8xf32>
      %c0_42 = arith.constant 0 : index
      %c0_43 = arith.constant 0 : index
      %c0_44 = arith.constant 0 : index
      %55 = vector.load %arg21[%c0_42, %c0_43, %c0_44] : memref<4x8x8xf32, #tpu.memory_space<vmem>>, vector<4x8x8xf32>
      tpu.vector_store %arg21[%c0_42, %c0_43, %c0_44], %54 {strides = array<i32>} : memref<4x8x8xf32, #tpu.memory_space<vmem>>, vector<4x8x8xf32>,
      %c0_45 = arith.constant 0 : index
      %c0_46 = arith.constant 0 : index
      %c0_47 = arith.constant 0 : index
      %56 = vector.load %arg19[%c0_45, %c0_46, %c0_47] : memref<4x8x1xf32, #tpu.memory_space<vmem>>, vector<4x8x1xf32>
      tpu.vector_store %arg19[%c0_45, %c0_46, %c0_47], %38 {strides = array<i32>} : memref<4x8x1xf32, #tpu.memory_space<vmem>>, vector<4x8x1xf32>,
    } else {
    }
    %c2_i32_23 = arith.constant 2 : i32
    %29 = arith.cmpi eq, %arg2, %c2_i32_23 : i32
    %30 = arith.extui %29 : i1 to i32
    %c0_i32_24 = arith.constant 0 : i32
    %31 = arith.cmpi ne, %30, %c0_i32_24 : i32
    scf.if %31 {
      %35 = tpu.iota {dimensions = array<i32: 2>} : vector<1x1x16xi32>
      %c16_i32 = arith.constant 16 : i32
      %36 = arith.muli %arg2, %c16_i32 : i32
      %37 = vector.broadcast %36 : i32 to vector<1x1x16xi32>
      %38 = arith.addi %35, %37 : vector<1x1x16xi32>
      %c40_i32 = arith.constant 40 : i32
      %39 = vector.broadcast %c40_i32 : i32 to vector<1x1x16xi32>
      %40 = arith.cmpi slt, %38, %39 : vector<1x1x16xi32>
      %cst_27 = arith.constant -1.000000e+30 : f32
      %41 = vector.shape_cast %40 : vector<1x1x16xi1> to vector<1x1x16xi1>
      %42 = vector.broadcast %41 : vector<1x1x16xi1> to vector<4x8x16xi1>
      %43 = vector.broadcast %cst_27 : f32 to vector<4x8x16xf32>
      %44 = arith.select %42, %25, %43 : vector<4x8x16xi1>, vector<4x8x16xf32>
      %c0_28 = arith.constant 0 : index
      %c0_29 = arith.constant 0 : index
      %c0_30 = arith.constant 0 : index
      %45 = vector.load %arg19[%c0_28, %c0_29, %c0_30] : memref<4x8x1xf32, #tpu.memory_space<vmem>>, vector<4x8x1xf32>
      %cst_31 = arith.constant dense<0xFF800000> : vector<4x8xf32>
      %46 = vector.multi_reduction <maximumf>, %44, %cst_31 [2] : vector<4x8x16xf32> to vector<4x8xf32>
      %47 = vector.shape_cast %46 : vector<4x8xf32> to vector<4x8x1xf32>
      %48 = arith.maximumf %45, %47 : vector<4x8x1xf32>
      %49 = arith.subf %45, %48 : vector<4x8x1xf32>
      %50 = math.exp %49 : vector<4x8x1xf32>
      %51 = vector.broadcast %48 : vector<4x8x1xf32> to vector<4x8x16xf32>
      %52 = arith.subf %44, %51 : vector<4x8x16xf32>
      %53 = math.exp %52 : vector<4x8x16xf32>
      %c0_32 = arith.constant 0 : index
      %c0_33 = arith.constant 0 : index
      %c0_34 = arith.constant 0 : index
      %54 = vector.load %arg20[%c0_32, %c0_33, %c0_34] : memref<4x8x1xf32, #tpu.memory_space<vmem>>, vector<4x8x1xf32>
      %55 = arith.mulf %50, %54 : vector<4x8x1xf32>
      %cst_35 = arith.constant dense<0.000000e+00> : vector<4x8xf32>
      %56 = vector.multi_reduction <add>, %53, %cst_35 [2] : vector<4x8x16xf32> to vector<4x8xf32>
      %57 = vector.shape_cast %56 : vector<4x8xf32> to vector<4x8x1xf32>
      %58 = arith.addf %55, %57 : vector<4x8x1xf32>
      %c0_36 = arith.constant 0 : index
      %c0_37 = arith.constant 0 : index
      %c0_38 = arith.constant 0 : index
      %59 = vector.load %arg20[%c0_36, %c0_37, %c0_38] : memref<4x8x1xf32, #tpu.memory_space<vmem>>, vector<4x8x1xf32>
      tpu.vector_store %arg20[%c0_36, %c0_37, %c0_38], %58 {strides = array<i32>} : memref<4x8x1xf32, #tpu.memory_space<vmem>>, vector<4x8x1xf32>,
      "tpu.trace_start"() <{level = 10 : i32, message = "hlt,htd->hld"}> : () -> ()
      %cst_39 = arith.constant dense<0.000000e+00> : vector<4x8x8xf32>
      %60 = tpu.matmul %53, %23, %cst_39 {dimension_numbers = #tpu.dot_dimension_numbers<[2], [1], [1], [2], [0, 0, 0, 1, 1, 2], [0], [0]>} : vector<4x8x16xf32>, vector<4x16x8xf32>, vector<4x8x8xf32> -> vector<4x8x8xf32>
      "tpu.trace_stop"() : () -> ()
      %c0_40 = arith.constant 0 : index
      %c0_41 = arith.constant 0 : index
      %c0_42 = arith.constant 0 : index
      %61 = vector.load %arg21[%c0_40, %c0_41, %c0_42] : memref<4x8x8xf32, #tpu.memory_space<vmem>>, vector<4x8x8xf32>
      %62 = vector.broadcast %50 : vector<4x8x1xf32> to vector<4x8x8xf32>
      %63 = arith.mulf %62, %61 : vector<4x8x8xf32>
      %64 = arith.addf %63, %60 : vector<4x8x8xf32>
      %c0_43 = arith.constant 0 : index
      %c0_44 = arith.constant 0 : index
      %c0_45 = arith.constant 0 : index
      %65 = vector.load %arg21[%c0_43, %c0_44, %c0_45] : memref<4x8x8xf32, #tpu.memory_space<vmem>>, vector<4x8x8xf32>
      tpu.vector_store %arg21[%c0_43, %c0_44, %c0_45], %64 {strides = array<i32>} : memref<4x8x8xf32, #tpu.memory_space<vmem>>, vector<4x8x8xf32>,
      %c0_46 = arith.constant 0 : index
      %c0_47 = arith.constant 0 : index
      %c0_48 = arith.constant 0 : index
      %66 = vector.load %arg19[%c0_46, %c0_47, %c0_48] : memref<4x8x1xf32, #tpu.memory_space<vmem>>, vector<4x8x1xf32>
      tpu.vector_store %arg19[%c0_46, %c0_47, %c0_48], %48 {strides = array<i32>} : memref<4x8x1xf32, #tpu.memory_space<vmem>>, vector<4x8x1xf32>,
    } else {
    }
    %c2_i32_25 = arith.constant 2 : i32
    %32 = arith.cmpi eq, %arg2, %c2_i32_25 : i32
    %33 = arith.extui %32 : i1 to i32
    %c0_i32_26 = arith.constant 0 : i32
    %34 = arith.cmpi ne, %33, %c0_i32_26 : i32
    scf.if %34 {
      %c0_27 = arith.constant 0 : index
      %c0_28 = arith.constant 0 : index
      %c0_29 = arith.constant 0 : index
      %35 = vector.load %arg20[%c0_27, %c0_28, %c0_29] : memref<4x8x1xf32, #tpu.memory_space<vmem>>, vector<4x8x1xf32>
      %36 = tpu.reciprocal %35 : vector<4x8x1xf32> -> vector<4x8x1xf32>
      %c0_30 = arith.constant 0 : index
      %c0_31 = arith.constant 0 : index
      %c0_32 = arith.constant 0 : index
      %37 = vector.load %arg21[%c0_30, %c0_31, %c0_32] : memref<4x8x8xf32, #tpu.memory_space<vmem>>, vector<4x8x8xf32>
      %38 = vector.broadcast %36 : vector<4x8x1xf32> to vector<4x8x8xf32>
      %39 = arith.mulf %37, %38 : vector<4x8x8xf32>
      %40 = tpu.transpose %39, [1, 0, 2] : vector<4x8x8xf32> -> vector<8x4x8xf32>
      %41 = vector.shape_cast %40 : vector<8x4x8xf32> to vector<8x32xf32>
      %c0_33 = arith.constant 0 : index
      %c0_34 = arith.constant 0 : index
      %42 = vector.load %arg13[%c0_33, %c0_34] : memref<32x32xf32, #tpu.memory_space<vmem>>, vector<32x32xf32>
      %cst_35 = arith.constant dense<0.000000e+00> : vector<8x32xf32>
      %43 = tpu.matmul %41, %42, %cst_35 {dimension_numbers = #tpu.dot_dimension_numbers<[1], [0], [0], [1], [0, 0, 1, 1], [], []>} : vector<8x32xf32>, vector<32x32xf32>, vector<8x32xf32> -> vector<8x32xf32>
      %c0_36 = arith.constant 0 : index
      %c0_37 = arith.constant 0 : index
      %44 = vector.load %arg14[%c0_36, %c0_37] : memref<1x32xf32, #tpu.memory_space<vmem>>, vector<1x32xf32>
      %45 = vector.broadcast %44 : vector<1x32xf32> to vector<8x32xf32>
      %46 = arith.addf %43, %45 : vector<8x32xf32>
      %c0_38 = arith.constant 0 : index
      %c0_39 = arith.constant 0 : index
      %c0_40 = arith.constant 0 : index
      %47 = vector.load %arg3[%c0_38, %c0_39, %c0_40] : memref<1x8x32xf32, #tpu.memory_space<vmem>>, vector<1x8x32xf32>
      %48 = vector.shape_cast %47 : vector<1x8x32xf32> to vector<8x32xf32>
      %49 = arith.addf %48, %46 : vector<8x32xf32>
      %cst_41 = arith.constant dense<0.000000e+00> : vector<8xf32>
      %50 = vector.multi_reduction <add>, %49, %cst_41 [1] : vector<8x32xf32> to vector<8xf32>
      %51 = vector.shape_cast %50 : vector<8xf32> to vector<8x1xf32>
      %cst_42 = arith.constant 3.200000e+01 : f32
      %52 = vector.broadcast %cst_42 : f32 to vector<8x1xf32>
      %53 = arith.divf %51, %52 : vector<8x1xf32>
      %54 = vector.broadcast %53 : vector<8x1xf32> to vector<8x32xf32>
      %55 = arith.subf %49, %54 : vector<8x32xf32>
      %56 = arith.mulf %55, %55 : vector<8x32xf32>
      %cst_43 = arith.constant dense<0.000000e+00> : vector<8xf32>
      %57 = vector.multi_reduction <add>, %56, %cst_43 [1] : vector<8x32xf32> to vector<8xf32>
      %58 = vector.shape_cast %57 : vector<8xf32> to vector<8x1xf32>
      %cst_44 = arith.constant 3.200000e+01 : f32
      %59 = vector.broadcast %cst_44 : f32 to vector<8x1xf32>
      %60 = arith.divf %58, %59 : vector<8x1xf32>
      %cst_45 = arith.constant 9.99999974E-6 : f32
      %61 = vector.broadcast %cst_45 : f32 to vector<8x1xf32>
      %62 = arith.addf %60, %61 : vector<8x1xf32>
      %63 = math.rsqrt %62 : vector<8x1xf32>
      %64 = vector.broadcast %63 : vector<8x1xf32> to vector<8x32xf32>
      %65 = arith.mulf %55, %64 : vector<8x32xf32>
      %c0_46 = arith.constant 0 : index
      %c0_47 = arith.constant 0 : index
      %66 = vector.load %arg15[%c0_46, %c0_47] : memref<1x32xf32, #tpu.memory_space<vmem>>, vector<1x32xf32>
      %67 = vector.broadcast %66 : vector<1x32xf32> to vector<8x32xf32>
      %68 = arith.mulf %65, %67 : vector<8x32xf32>
      %c0_48 = arith.constant 0 : index
      %c0_49 = arith.constant 0 : index
      %69 = vector.load %arg16[%c0_48, %c0_49] : memref<1x32xf32, #tpu.memory_space<vmem>>, vector<1x32xf32>
      %70 = vector.broadcast %69 : vector<1x32xf32> to vector<8x32xf32>
      %71 = arith.addf %68, %70 : vector<8x32xf32>
      %c0_50 = arith.constant 0 : index
      %c0_51 = arith.constant 0 : index
      %c0_52 = arith.constant 0 : index
      %72 = vector.load %arg17[%c0_50, %c0_51, %c0_52] : memref<1x8x32xf32, #tpu.memory_space<vmem>>, vector<1x8x32xf32>
      %73 = vector.shape_cast %72 : vector<1x8x32xf32> to vector<8x32xf32>
      %74 = vector.shape_cast %71 : vector<8x32xf32> to vector<1x8x32xf32>
      tpu.vector_store %arg17[%c0_50, %c0_51, %c0_52], %74 {strides = array<i32>} : memref<1x8x32xf32, #tpu.memory_space<vmem>>, vector<1x8x32xf32>,
    } else {
    }
    return
  }
  func.func @transform_0(%arg0: i32, %arg1: i32, %arg2: i32) -> (i32, i32, i32) {
    %c0_i32 = arith.constant 0 : i32
    %c0_i32_0 = arith.constant 0 : i32
    return %arg0, %arg1, %c0_i32 : i32, i32, i32
  }
  func.func @transform_1(%arg0: i32, %arg1: i32, %arg2: i32) -> (i32, i32, i32) {
    %c0_i32 = arith.constant 0 : i32
    %c0_i32_0 = arith.constant 0 : i32
    return %arg0, %arg1, %c0_i32 : i32, i32, i32
  }
  func.func @transform_2(%arg0: i32, %arg1: i32, %arg2: i32) -> (i32, i32, i32) {
    %c0_i32 = arith.constant 0 : i32
    %c0_i32_0 = arith.constant 0 : i32
    return %arg0, %arg2, %c0_i32 : i32, i32, i32
  }
  func.func @transform_3(%arg0: i32, %arg1: i32, %arg2: i32) -> (i32, i32, i32) {
    %c0_i32 = arith.constant 0 : i32
    %c0_i32_0 = arith.constant 0 : i32
    return %arg0, %arg2, %c0_i32 : i32, i32, i32
  }
  func.func @transform_4(%arg0: i32, %arg1: i32, %arg2: i32) -> (i32, i32) {
    %c0_i32 = arith.constant 0 : i32
    %c0_i32_0 = arith.constant 0 : i32
    %c0_i32_1 = arith.constant 0 : i32
    return %c0_i32, %c0_i32_0 : i32, i32
  }
  func.func @transform_5(%arg0: i32, %arg1: i32, %arg2: i32) -> (i32, i32) {
    %c0_i32 = arith.constant 0 : i32
    %c0_i32_0 = arith.constant 0 : i32
    %c0_i32_1 = arith.constant 0 : i32
    return %c0_i32, %c0_i32_0 : i32, i32
  }
  func.func @transform_6(%arg0: i32, %arg1: i32, %arg2: i32) -> (i32, i32) {
    %c0_i32 = arith.constant 0 : i32
    %c0_i32_0 = arith.constant 0 : i32
    %c0_i32_1 = arith.constant 0 : i32
    return %c0_i32, %c0_i32_0 : i32, i32
  }
  func.func @transform_7(%arg0: i32, %arg1: i32, %arg2: i32) -> (i32, i32) {
    %c0_i32 = arith.constant 0 : i32
    %c0_i32_0 = arith.constant 0 : i32
    %c0_i32_1 = arith.constant 0 : i32
    return %c0_i32, %c0_i32_0 : i32, i32
  }
  func.func @transform_8(%arg0: i32, %arg1: i32, %arg2: i32) -> (i32, i32) {
    %c0_i32 = arith.constant 0 : i32
    %c0_i32_0 = arith.constant 0 : i32
    %c0_i32_1 = arith.constant 0 : i32
    return %c0_i32, %c0_i32_0 : i32, i32
  }
  func.func @transform_9(%arg0: i32, %arg1: i32, %arg2: i32) -> (i32, i32) {
    %c0_i32 = arith.constant 0 : i32
    %c0_i32_0 = arith.constant 0 : i32
    %c0_i32_1 = arith.constant 0 : i32
    return %c0_i32, %c0_i32_0 : i32, i32
  }
  func.func @transform_10(%arg0: i32, %arg1: i32, %arg2: i32) -> (i32, i32) {
    %c0_i32 = arith.constant 0 : i32
    %c0_i32_0 = arith.constant 0 : i32
    %c0_i32_1 = arith.constant 0 : i32
    return %c0_i32, %c0_i32_0 : i32, i32
  }
  func.func @transform_11(%arg0: i32, %arg1: i32, %arg2: i32) -> (i32, i32) {
    %c0_i32 = arith.constant 0 : i32
    %c0_i32_0 = arith.constant 0 : i32
    %c0_i32_1 = arith.constant 0 : i32
    return %c0_i32, %c0_i32_0 : i32, i32
  }
  func.func @transform_12(%arg0: i32, %arg1: i32, %arg2: i32) -> (i32, i32) {
    %c0_i32 = arith.constant 0 : i32
    %c0_i32_0 = arith.constant 0 : i32
    %c0_i32_1 = arith.constant 0 : i32
    return %c0_i32, %c0_i32_0 : i32, i32
  }
  func.func @transform_13(%arg0: i32, %arg1: i32, %arg2: i32) -> (i32, i32) {
    %c0_i32 = arith.constant 0 : i32
    %c0_i32_0 = arith.constant 0 : i32
    %c0_i32_1 = arith.constant 0 : i32
    return %c0_i32, %c0_i32_0 : i32, i32
  }
  func.func @transform_14(%arg0: i32, %arg1: i32, %arg2: i32) -> (i32, i32, i32) {
    %c0_i32 = arith.constant 0 : i32
    %c0_i32_0 = arith.constant 0 : i32
    return %arg0, %arg1, %c0_i32 : i32, i32, i32
  }
}

</mosaic_0001>

<bundles_post_ra>
// kernel: tpu_custom_call.1
= control target key start
LH: loop header
LB: loop body
LE: loop exit
PB: predicated region body
PF: predicated region fallthrough
CT: control target
= control target key end

     0   :  { %s3427_s0 = inlined_call_operand.vmem [shape: f32[2,8,32], index: 0, kind: input, shape index: {}]   ;;  %s3428_s1 = inlined_call_operand.vmem [shape: f32[2,8,32], index: 1, kind: input, shape index: {}]   ;;  %s3429_s2 = inlined_call_operand.vmem [shape: f32[2,48,32], index: 2, kind: input, shape index: {}]   ;;  %s3430_s3 = inlined_call_operand.vmem [shape: f32[2,48,32], index: 3, kind: input, shape index: {}]   ;;  %s3431_s4 = inlined_call_operand.vmem [shape: f32[32,32], index: 4, kind: input, shape index: {}]   ;;  %s3432_s5 = inlined_call_operand.vmem [shape: f32[32,32], index: 5, kind: input, shape index: {}]   ;;  %s3433_s6 = inlined_call_operand.vmem [shape: f32[32,32], index: 6, kind: input, shape index: {}]   ;;  %s3434_s7 = inlined_call_operand.vmem [shape: f32[1,32], index: 7, kind: input, shape index: {}]   ;;  %s3435_s8 = inlined_call_operand.vmem [shape: f32[1,32], index: 8, kind: input, shape index: {}]   ;;  %s3436_s9 = inlined_call_operand.vmem [shape: f32[1,32], index: 9, kind: input, shape index: {}]   ;;  %s3437_s10 = inlined_call_operand.vmem [shape: f32[32,32], index: 10, kind: input, shape index: {}]   ;;  %s3438_s11 = inlined_call_operand.vmem [shape: f32[1,32], index: 11, kind: input, shape index: {}]   ;;  %s3439_s12 = inlined_call_operand.vmem [shape: f32[1,32], index: 12, kind: input, shape index: {}]   ;;  %s3440_s13 = inlined_call_operand.vmem [shape: f32[1,32], index: 13, kind: input, shape index: {}]   ;;  %s3441_s14 = inlined_call_operand.hbm [shape: f32[2,8,32], index: 14, kind: output, shape index: {}]  }
   0x1   :  { %3456 = sst [smem:[#allocation21_spill]] %s3438_s11 }
   0x2   :  { %3457 = sst [smem:[#allocation22_spill]] %s3439_s12 }
   0x3   :  { %3458 = sst [smem:[#allocation23_spill]] %s3440_s13 }
   0x4   :  { %3459 = sst [smem:[#allocation24_spill]] %s3441_s14 }
   0x5   :  { %19 = vsyncpa [#allocation7], 0 }
   0x6   :  { %21 = vsyncpa [#allocation7 + $0x1], 0  ;;  %s2757_s29 = smov 0   ;;  %s2759_s30 = smov 0  }
   0x7   :  { %s2761_s15 = smov 0   ;;  %s2763_s16 = smov 0  }
   0x8   :  { %s2765_s17 = smov 0   ;;  %s2767_s18 = smov 0  }
   0x9   :  { %s2769_s19 = smov 0   ;;  %s2771_s20 = smov 0  }
   0xa LB: > { %3460 = sst [smem:[#allocation9_spill]] %s2634_s29  ;;  %s2361_s21 = sadd.s32 4294967295, %s2662_s20   ;;  %s2662_s20 = sphi %s2771_s20, %s27_s20   ;;  %s2658_s19 = sphi %s2769_s19, %s3492_s19   ;;  %s2654_s18 = sphi %s2767_s18, %s3491_s18   ;;  %s2650_s17 = sphi %s2765_s17, %s3490_s17   ;;  %s2646_s16 = sphi %s2763_s16, %s3489_s16   ;;  %s2642_s15 = sphi %s2761_s15, %s3488_s15   ;;  %s2638_s30 = sphi %s2759_s30, %s3487_s30   ;;  %s2634_s29 = sphi %s2757_s29, %s3486_s29  }
   0xb   : > { %3461 = sst [smem:[#allocation10_spill]] %s2638_s30  ;;  %s2362_s22 = sadd.s32 4294967294, %s2662_s20  }
   0xc   : > { %3462 = sst [smem:[#allocation11_spill]] %s2642_s15  ;;  %s39_s23 = sadd.s32 1, %s2654_s18 }
   0xd   : > { %3463 = sst [smem:[#allocation12_spill]] %s2650_s17  ;;  %p40_p0 = scmp.ge.s32.totalorder %s39_s23, 3 }
   0xe   : > { %3464 = sst [smem:[#allocation13_spill]] %s2654_s18  ;;  %s46_s24 = sadd.s32 1, %s2658_s19 }
   0xf   : > { %3465 = sst [smem:[#allocation14_spill]] %s2658_s19  ;;  %p387_p1 = scmp.ne.s32.totalorder %s2642_s15, %s2638_s30 }
  0x10   : > { %3466 = sst [smem:[#allocation15_spill]] %s2662_s20  ;;  %p388_p2 = scmp.eq.s32.totalorder %s2361_s21, 5 }
  0x11   : > { %s3494_s23 = smov (%p40_p0, %s39_s23), 0  ;;  %s3496_s24 = smov (!%p40_p0, %s46_s24), %s2658_s19 }
  0x12   : > { %3467 = sst [smem:[#allocation16_spill]] %s3494_s23  ;;  %p2806_p3 = por %p388_p2, %p387_p1 }
  0x13   : > { %p393_p4 = scmp.ne.s32.totalorder %s2638_s30, %s2634_s29  ;;  %p48_p5 = scmp.ge.s32.totalorder %s3496_s24, 2 }
  0x14   : > { %s3468_s25 = scalar_select %p2806_p3, 1, 0 }
  0x15   : > { %p394_p6 = scmp.eq.s32.totalorder %s2362_s22, 5  ;;  %p2365_p7 = scmp.ge.s32.totalorder %s2662_s20, 1 }
  0x16   : > { %3469 = sst [smem:[#allocation17_spill]] %s3468_s25  ;;  %p488_p8 = scmp.lt.s32.totalorder %s2662_s20, 7 }
  0x17   : > { %s3498_s24 = smov (%p48_p5, %s3496_s24), 0  ;;  %p2816_p9 = por %p394_p6, %p393_p4 }
  0x18   : > { %3470 = sst [smem:[#allocation18_spill]] %s3498_s24  ;;  %p489_p10 = pnand %p2365_p7, %p488_p8 }
  0x19   : > { %s3471_s26 = scalar_select %p2816_p9, 1, 0 }
  0x1a   : > { %s372_s27 = ssub.s32 %s2658_s19, %s3498_s24  ;;  %s377_s28 = sadd.s32 1, %s2642_s15 }
  0x1b   : > { %3472 = sst [smem:[#allocation19_spill]] %s3471_s26  ;;  %p375_p11 = scmp.eq.s32.totalorder %s372_s27, 0 }
  0x1c   : > { %492 = sbr.rel (%p489_p10) target bundleno = 2248 (0x8c8), region = 76  ;;  %s3453_s22 = sand.u32 (!%p489_p10), 1, %s2638_s30  }
  0x1d   : > { %s2824_s21 = scalar_select %p375_p11, %s2642_s15, %s377_s28  }
  0x1e   : > { %p561_p12 = scmp.lt.s32.totalorder (!%p489_p10), %s2650_s17, 1  ;;  %s2830_s23 = sshll.u32 (!%p489_p10), %s3453_s22, 3 }
  0x1f   : > { %3473 = sst [smem:[#allocation20_spill]] %s2824_s21  ;;  %s2369_s18 = sshll.u32 (!%p489_p10), %s2646_s16, 1 }
  0x20   : > { %p578_p13 = scmp.lt.s32.totalorder (!%p489_p10), %s2369_s18, 5  ;;  %s560_s11 = scalar_lea.vmem (!%p489_p10), [#allocation6], %s2830_s23 }
  0x21   : > { %s562_s26 = scalar_select %p561_p12, %s2650_s17, 1 }
  0x22   : > { %s3500_s18 = smov (!%p578_p13, %s2369_s18), 5  ;;  %p2373_p0 = scmp.ne.s32.totalorder %s2646_s16, 0 }
  0x23   : > { %s2367_s24 = sshll.u32 %s562_s26, 3  ;;  %s2407_s27 = smul.u32 6, %s562_s26 }
  0x24   : > { %s2837_s21 = scalar_lea.vmem %s3427_s0, %s2367_s24  ;;  %s574_s20 = scalar_lea.vmem %s3428_s1, %s2367_s24 }
  0x25   : > { %s581_s14 = sadd.s32 %s2407_s27, %s3500_s18  ;;  %598 = sbr.rel (%p2373_p0) target bundleno = 328 (0x148), region = 80 }
  0x26   : > { %s2370_s25 = sshll.u32 %s581_s14, 3  ;;  %s2666_s22 = smov (!%p2373_p0), 120  }
  0x27   : > { %s2845_s13 = scalar_lea.vmem %s3429_s2, %s2370_s25  ;;  %s2850_s26 = scalar_lea.vmem %s3430_s3, %s2370_s25 }
  0x28   : > { %s2665_s25 = smov (!%p2373_p0), 112  }
  0x2a   : > { %v619_v0 = vld [vmem:[%s3431_s4 + $0x18] sm:$0xff]  ;;  %v618_v1 = vld [vmem:[%s3431_s4 + $0x10] sm:$0xff]  ;;  %v613_v2 = vld [vmem:[%s2837_s21] sm:$0xff]  ;;  %vm624_vm0 = vcmask 261120   ;;  %vm599_vm1 = vcmask 7168   ;;  %v2667_v11 = vmov -inf  }
  0x2b   : > { %640 = vmatpush.msra.mxu0 %v619_v0  ;;  %v614_v3 = vld [vmem:[%s574_s20] sm:$0xff]  ;;  %v617_v4 = vld [vmem:[%s3431_s4 + $0x8] sm:$0xff]  ;;  %s2664_s20 = smov 104   ;;  %600 = vst.msk [vmem:[#allocation3] sm:$0xff] %vm599_vm1, %v2667_v11  ;;  %v2668_v12 = vmov 0.0   ;;  %vm608_vm2 = vcmask 64512  }
  0x2c   : > { %v616_v5 = vld [vmem:[%s3431_s4] sm:$0xff]  ;;  %v615_v6 = vadd.f32 %v614_v3, %v613_v2  ;;  %601 = vst.msk [vmem:[#allocation3 + $0x8] sm:$0xff] %vm599_vm1, %v2667_v11  ;;  %v2669_v13 = vmov 1983009808   ;;  %vm660_vm3 = vcmask 1047556  }
  0x2d   : > { %641 = vmatpush.msra.mxu0 %v618_v1  ;;  %v2497_v7 = vld [vmem:[%s3434_s7] ss:$0 sm:$0xff]  ;;  %602 = vst.msk [vmem:[#allocation3 + $0x10] sm:$0xff] %vm599_vm1, %v2667_v11  ;;  %v665_v14 = vunpack.c.l.s4 %v2669_v13  ;;  %v2670_v22 = vmov 1934713408  }
  0x2e   : > { %603 = vst.msk [vmem:[#allocation3 + $0x18] sm:$0xff] %vm599_vm1, %v2667_v11  ;;  %v689_v23 = vunpack.c.l.s4 %v2670_v22 }
  0x2f   : > { %642 = vmatpush.msra.mxu0 %v617_v4  ;;  %604 = vst.msk [vmem:[#allocation4] sm:$0xff] %vm599_vm1, %v2668_v12  ;;  %v666_v20 = vunpack.c.0.s8 %v665_v14 }
  0x30   : > { %605 = vst.msk [vmem:[#allocation4 + $0x8] sm:$0xff] %vm599_vm1, %v2668_v12  ;;  %v690_v28 = vunpack.c.0.s8 %v689_v23 }
  0x31   : > { %643 = vmatpush.msra.mxu0 %v616_v5  ;;  %606 = vst.msk [vmem:[#allocation4 + $0x10] sm:$0xff] %vm599_vm1, %v2668_v12 }
  0x32   : > { %2374 = vmatmul.msk.f32.vlgmr.msra.gmra.mxu0 %vm624_vm0, %v615_v6  ;;  %607 = vst.msk [vmem:[#allocation4 + $0x18] sm:$0xff] %vm599_vm1, %v2668_v12 }
  0x33   : > { %609 = vst.msk [vmem:[#allocation5] sm:$0xff] %vm608_vm2, %v2668_v12 }
  0x34   : > { %610 = vst.msk [vmem:[#allocation5 + $0x8] sm:$0xff] %vm608_vm2, %v2668_v12 }
  0x35   : > { %611 = vst.msk [vmem:[#allocation5 + $0x10] sm:$0xff] %vm608_vm2, %v2668_v12 }
  0x36   : > { %612 = vst.msk [vmem:[#allocation5 + $0x18] sm:$0xff] %vm608_vm2, %v2668_v12 }
  0xaf   : > { %v645_v8 = vpop.f32.mrf.mxu0 }
  0xb0   : > { %v646_v9 = vadd.f32 %v2497_v7, %v645_v8 }
  0xb2   : > { %v648_v10 = vmul.f32 0.35355338, %v646_v9 }
  0xb4   : > { %656 = vrot.lane.b32.xlu1 %v648_v10, %s2664_s20  ;;  %653 = vrot.lane.b32.xlu0 %v648_v10, %s2665_s25  ;;  %v662_v18 = vrot.slane %v648_v10, 4 }
  0xbc   : > { %650 = vrot.lane.b32.xlu0 %v648_v10, %s2666_s22 }
 0x126   : > { %v654_v15 = vpop.permute.xlu0 %653  ;;  %v657_v19 = vpop.permute.xlu1 %656 }
 0x127   : > { %v659_v16 = vrot.slane %v654_v15, 4  ;;  %v663_v21 = vsel %vm660_vm3, %v654_v15, %v662_v18  ;;  %v672_v25 = vrot.slane %v657_v19, 4 }
 0x128   : > { %v671_v26 = vperm.slane %v663_v21, %v666_v20 }
 0x129   : > { %v661_v17 = vsel %vm660_vm3, %v659_v16, %v648_v10 }
 0x12a   : > { %v667_v24 = vperm.slane %v661_v17, %v666_v20  ;;  %v698_v34 = vrot.slane %v671_v26, 4 }
 0x12c   : > { %v686_v31 = vrot.slane %v667_v24, 4 }
 0x12e   : > { %v651_v27 = vpop.permute.xlu0 %650 }
 0x12f   : > { %v673_v29 = vsel %vm660_vm3, %v672_v25, %v651_v27  ;;  %v674_v30 = vrot.slane %v651_v27, 4 }
 0x130   : > { %v679_v32 = vperm.slane %v673_v29, %v666_v20 }
 0x131   : > { %v675_v33 = vsel %vm660_vm3, %v657_v19, %v674_v30 }
 0x132   : > { %v683_v35 = vperm.slane %v675_v33, %v666_v20  ;;  %v684_v36 = vrot.slane %v679_v32, 4  ;;  %v687_v37 = vsel %vm660_vm3, %v679_v32, %v686_v31 }
 0x133   : > { %v695_v38 = vperm.slane %v687_v37, %v690_v28 }
 0x134   : > { %v685_v39 = vsel %vm660_vm3, %v684_v36, %v667_v24  ;;  %v696_v40 = vrot.slane %v683_v35, 4  ;;  %v699_v41 = vsel %vm660_vm3, %v683_v35, %v698_v34 }
 0x135   : > { %v691_v42 = vperm.slane %v685_v39, %v690_v28  ;;  %v707_v43 = vperm.slane %v699_v41, %v690_v28  ;;  %v710_v44 = vrot.slane %v695_v38, 4 }
 0x136   : > { %v697_v45 = vsel %vm660_vm3, %v696_v40, %v671_v26 }
 0x137   : > { %v703_v46 = vperm.slane %v697_v45, %v690_v28  ;;  %v708_v47 = vrot.slane %v691_v42, 4  ;;  %v711_v48 = vsel %vm660_vm3, 0.0, %v710_v44  ;;  %v714_v49 = vrot.slane %v707_v43, 4 }
 0x138   : > { %v716_v50 = vsel %vm660_vm3, %v710_v44, %v691_v42  ;;  %v721_v51 = vrot.slane %v711_v48, 4 }
 0x139   : > { %v709_v52 = vsel %vm660_vm3, 0.0, %v708_v47  ;;  %v712_v53 = vrot.slane %v703_v46, 4  ;;  %v715_v54 = vsel %vm660_vm3, 0.0, %v714_v49  ;;  %v720_v55 = vperm.slane %v716_v50, %v666_v20 }
 0x13a   : > { %v722_v56 = vsel %vm660_vm3, %v721_v51, %v709_v52  ;;  %v727_v57 = vsel %vm660_vm3, %v714_v49, %v703_v46  ;;  %v732_v58 = vrot.slane %v715_v54, 4 }
 0x13b   : > { %v713_v59 = vsel %vm660_vm3, 0.0, %v712_v53  ;;  %v726_v60 = vperm.slane %v722_v56, %v666_v20  ;;  %v731_v61 = vperm.slane %v727_v57, %v666_v20  ;;  %v740_v62 = vrot.slane %v720_v55, 4 }
 0x13c   : > { %v733_v63 = vsel %vm660_vm3, %v732_v58, %v713_v59 }
 0x13d   : > { %v737_v0 = vperm.slane %v733_v63, %v666_v20  ;;  %v738_v1 = vrot.slane %v726_v60, 4  ;;  %v741_v2 = vsel %vm660_vm3, %v726_v60, %v740_v62  ;;  %v752_v3 = vrot.slane %v731_v61, 4 }
 0x13e   : > { %v749_v4 = vperm.slane %v741_v2, %v690_v28 }
 0x13f   : > { %v739_v5 = vsel %vm660_vm3, %v738_v1, %v720_v55  ;;  %v750_v6 = vrot.slane %v737_v0, 4  ;;  %v753_v7 = vsel %vm660_vm3, %v737_v0, %v752_v3 }
 0x140   : > { %v745_v8 = vperm.slane %v739_v5, %v690_v28  ;;  %v761_v9 = vperm.slane %v753_v7, %v690_v28  ;;  %v768_v10 = vrot.slane %v749_v4, 4 }
 0x141   : > { %v751_v11 = vsel %vm660_vm3, %v750_v6, %v731_v61 }
 0x142   : > { %v757_v12 = vperm.slane %v751_v11, %v690_v28  ;;  %v764_v13 = vrot.slane %v745_v8, 4  ;;  %v766_v14 = vrot.slane %v761_v9, 4  ;;  %v769_v15 = vsel %vm660_vm3, %v761_v9, %v768_v10 }
 0x143   : > { %773 = vst.msk [vmem:[#allocation2 + $0x18] sm:$0xff] %vm608_vm2, %v769_v15 }
 0x144   : > { %v762_v16 = vrot.slane %v757_v12, 4  ;;  %v765_v17 = vsel %vm660_vm3, %v757_v12, %v764_v13  ;;  %v767_v18 = vsel %vm660_vm3, %v766_v14, %v749_v4 }
 0x145   : > { %771 = vst.msk [vmem:[#allocation2 + $0x8] sm:$0xff] %vm608_vm2, %v765_v17 }
 0x146   : > { %v763_v19 = vsel %vm660_vm3, %v762_v16, %v745_v8  ;;  %772 = vst.msk [vmem:[#allocation2 + $0x10] sm:$0xff] %vm608_vm2, %v767_v18 }
 0x147   : > { %770 = vst.msk [vmem:[#allocation2] sm:$0xff] %vm608_vm2, %v763_v19 }
 0x148 PF: > { %v783_v20 = vld [vmem:[%s3432_s5 + $0x18] sm:$0xff]  ;;  %v782_v21 = vld [vmem:[%s3432_s5 + $0x10] sm:$0xff]  ;;  %v774_v22 = vld [vmem:[%s2845_s13] sm:$0xff]  ;;  %vm788_vm4 = vcmask 261120   ;;  %s2671_s29 = smov 120   ;;  %s2672_s30 = smov 104  }
 0x149   : > { %807 = vmatpush.msra.mxu0 %v783_v20  ;;  %v776_v23 = vld [vmem:[%s2850_s26] sm:$0xff]  ;;  %v781_v24 = vld [vmem:[%s3432_s5 + $0x8] sm:$0xff]  ;;  %v821_v25 = vld [vmem:[%s3433_s6 + $0x18] sm:$0xff]  ;;  %s2673_s12 = smov 112   ;;  %v2674_v47 = vmov 1983009808  }
 0x14a   : > { %v780_v26 = vld [vmem:[%s3432_s5] sm:$0xff]  ;;  %844 = vmatpush.msra.mxu1 %v821_v25  ;;  %v820_v27 = vld [vmem:[%s3433_s6 + $0x10] sm:$0xff]  ;;  %v778_v28 = vadd.f32 %v776_v23, %v774_v22  ;;  %v819_v29 = vld [vmem:[%s3433_s6 + $0x8] sm:$0xff]  ;;  %v881_v48 = vunpack.c.l.s4 %v2674_v47  ;;  %vm876_vm5 = vcmask 1047556   ;;  %v2675_v59 = vmov 1934713408  }
 0x14b   : > { %808 = vmatpush.msra.mxu0 %v782_v21  ;;  %v818_v30 = vld [vmem:[%s3433_s6] sm:$0xff]  ;;  %v775_v31 = vld [vmem:[%s2845_s13 + $0x8] sm:$0xff]  ;;  %v905_v60 = vunpack.c.l.s4 %v2675_v59  ;;  %vm1340_vm6 = vcmask 64512   ;;  %p2391_p1 = scmp.ge.s32.totalorder %s2646_s16, 2 }
 0x14c   : > { %845 = vmatpush.msra.mxu1 %v820_v27  ;;  %v777_v32 = vld [vmem:[%s2850_s26 + $0x8] sm:$0xff]  ;;  %v2513_v34 = vld [vmem:[%s3435_s8] ss:$0 sm:$0xff]  ;;  %v2951_v51 = vunpack.c.0.s8 %v881_v48 }
 0x14d   : > { %809 = vmatpush.msra.mxu0 %v781_v24  ;;  %v779_v33 = vadd.f32 %v777_v32, %v775_v31  ;;  %v2514_v40 = vld [vmem:[%s3436_s9] ss:$0 sm:$0xff]  ;;  %v2964_v5 = vunpack.c.0.s8 %v905_v60 }
 0x14e   : > { %846 = vmatpush.msra.mxu1 %v819_v29 }
 0x14f   : > { %810 = vmatpush.msra.mxu0 %v780_v26 }
 0x150   : > { %2375 = vmatmul.msk.f32.vlgmr.msra.gmra.mxu0 %vm788_vm4, %v778_v28  ;;  %847 = vmatpush.msra.mxu1 %v818_v30 }
 0x151   : > { %2377 = vmatmul.msk.f32.vlgmr.msra.gmra.mxu1 %vm788_vm4, %v774_v22 }
 0x158   : > { %2376 = vmatmul.msk.f32.gmra.mxu0 %vm788_vm4, %v779_v33 }
 0x159   : > { %2378 = vmatmul.msk.f32.gmra.mxu1 %vm788_vm4, %v775_v31 }
 0x1cd   : > { %v812_v35 = vpop.f32.mrf.mxu0 }
 0x1ce   : > { %v2937_v36 = vadd.f32 %v2513_v34, %v812_v35  ;;  %v849_v37 = vpop.f32.mrf.mxu1 }
 0x1cf   : > { %v2944_v42 = vadd.f32 %v2514_v40, %v849_v37 }
 0x1d0   : > { %857 = vrot.lane.b32.xlu2 %v2937_v36, %s2671_s29  ;;  %v878_v2 = vrot.slane %v2937_v36, 4 }
 0x1d1   : > { %v1118_v11 = vrot.slane %v2944_v42, 4 }
 0x1d5   : > { %v815_v38 = vpop.f32.mrf.mxu0 }
 0x1d6   : > { %v816_v39 = vadd.f32 %v2513_v34, %v815_v38  ;;  %v852_v41 = vpop.f32.mrf.mxu1 }
 0x1d7   : > { %v2946_v43 = vadd.f32 %v2514_v40, %v852_v41 }
 0x1d8   : > { %871 = vrot.lane.b32.xlu1 %v816_v39, %s2672_s30  ;;  %865 = vrot.lane.b32.xlu0 %v816_v39, %s2673_s12  ;;  %v934_v57 = vrot.slane %v816_v39, 4 }
 0x1d9   : > { %869 = vrot.lane.b32.xlu2 %v2937_v36, %s2672_s30  ;;  %v2508_v44 = vpack.i.bf16 %v2946_v43, %v2944_v42  ;;  %v1174_v20 = vrot.slane %v2946_v43, 4 }
 0x1e0   : > { %859 = vrot.lane.b32.xlu0 %v816_v39, %s2671_s29  ;;  %863 = vrot.lane.b32.xlu1 %v2937_v36, %s2673_s12 }
 0x1e1   : > { %2509 = vrot.lane.b32.xlu2 %v2508_v44, %s2672_s30 }
 0x1e8   : > { %2499 = vrot.lane.b32.xlu0 %v2508_v44, %s2673_s12  ;;  %2504 = vrot.lane.b32.xlu1 %v2508_v44, %s2671_s29 }
 0x22a   : > { %v858_v45 = vpop.permute.xlu2 %857 }
 0x22b   : > { %v890_v50 = vrot.slane %v858_v45, 4 }
 0x233   : > { %v870_v46 = vpop.permute.xlu2 %869 }
 0x234   : > { %v888_v49 = vrot.slane %v870_v46, 4  ;;  %v891_v55 = vsel %vm876_vm5, %v870_v46, %v890_v50 }
 0x235   : > { %v899_v62 = vperm.slane %v891_v55, %v2951_v51 }
 0x236   : > { %v889_v54 = vsel %vm876_vm5, %v888_v49, %v858_v45 }
 0x237   : > { %v895_v61 = vperm.slane %v889_v54, %v2951_v51  ;;  %v912_v8 = vrot.slane %v899_v62, 4 }
 0x239   : > { %v900_v7 = vrot.slane %v895_v61, 4 }
 0x23b   : > { %v2959_v0 = vpop.permute.xlu2 %2509 }
 0x23c   : > { %v2511_v6 = vunpack.i.l.bf16 %v2959_v0  ;;  %v2512_v12 = vunpack.i.h.bf16 %v2959_v0 }
 0x23e   : > { %v2979_v24 = vrot.slane %v2511_v6, 4  ;;  %v1184_v32 = vrot.slane %v2512_v12, 4 }
 0x24a   : > { %v872_v52 = vpop.permute.xlu1 %871  ;;  %v866_v53 = vpop.permute.xlu0 %865 }
 0x24b   : > { %v932_v56 = vrot.slane %v866_v53, 4  ;;  %v935_v63 = vsel %vm876_vm5, %v866_v53, %v934_v57  ;;  %v944_v3 = vrot.slane %v872_v52, 4 }
 0x24c   : > { %v943_v4 = vperm.slane %v935_v63, %v2951_v51 }
 0x24d   : > { %v933_v58 = vsel %vm876_vm5, %v932_v56, %v816_v39 }
 0x24e   : > { %v939_v1 = vperm.slane %v933_v58, %v2951_v51  ;;  %v970_v21 = vrot.slane %v943_v4, 4 }
 0x250   : > { %v958_v17 = vrot.slane %v939_v1, 4 }
 0x252   : > { %v860_v9 = vpop.permute.xlu0 %859  ;;  %v864_v10 = vpop.permute.xlu1 %863 }
 0x253   : > { %v945_v13 = vsel %vm876_vm5, %v944_v3, %v860_v9  ;;  %v946_v14 = vrot.slane %v860_v9, 4  ;;  %v875_v15 = vrot.slane %v864_v10, 4  ;;  %v879_v16 = vsel %vm876_vm5, %v864_v10, %v878_v2 }
 0x254   : > { %v951_v18 = vperm.slane %v945_v13, %v2951_v51  ;;  %v887_v19 = vperm.slane %v879_v16, %v2951_v51 }
 0x255   : > { %v947_v22 = vsel %vm876_vm5, %v872_v52, %v946_v14  ;;  %v877_v23 = vsel %vm876_vm5, %v875_v15, %v2937_v36 }
 0x256   : > { %v955_v25 = vperm.slane %v947_v22, %v2951_v51  ;;  %v956_v26 = vrot.slane %v951_v18, 4  ;;  %v959_v27 = vsel %vm876_vm5, %v951_v18, %v958_v17  ;;  %v883_v28 = vperm.slane %v877_v23, %v2951_v51 }
 0x257   : > { %v967_v29 = vperm.slane %v959_v27, %v2964_v5  ;;  %v913_v30 = vsel %vm876_vm5, %v912_v8, %v887_v19  ;;  %v914_v31 = vrot.slane %v887_v19, 4 }
 0x258   : > { %v957_v33 = vsel %vm876_vm5, %v956_v26, %v939_v1  ;;  %v968_v34 = vrot.slane %v955_v25, 4  ;;  %v971_v35 = vsel %vm876_vm5, %v955_v25, %v970_v21  ;;  %v901_v36 = vsel %vm876_vm5, %v900_v7, %v883_v28 }
 0x259   : > { %v963_v37 = vperm.slane %v957_v33, %v2964_v5  ;;  %v979_v38 = vperm.slane %v971_v35, %v2964_v5  ;;  %v982_v39 = vrot.slane %v967_v29, 4  ;;  %v902_v40 = vrot.slane %v883_v28, 4 }
 0x25a   : > { %v969_v41 = vsel %vm876_vm5, %v968_v34, %v943_v4  ;;  %v2995_v44 = vperm.slane %v901_v36, %v2964_v5  ;;  %v915_v45 = vsel %vm876_vm5, %v899_v62, %v914_v31  ;;  %v2999_v46 = vperm.slane %v913_v30, %v2964_v5  ;;  %v2500_v56 = vpop.permute.xlu0 %2499  ;;  %v2505_v62 = vpop.permute.xlu1 %2504 }
 0x25b   : > { %v3002_v47 = vperm.slane %v969_v41, %v2964_v5  ;;  %v980_v48 = vrot.slane %v963_v37, 4  ;;  %v983_v49 = vsel %vm876_vm5, 0.0, %v982_v39  ;;  %v3005_v50 = vrot.slane %v979_v38, 4 }
 0x25c   : > { %v1042_v52 = vsel %vm876_vm5, %v982_v39, %v963_v37  ;;  %v1047_v53 = vrot.slane %v983_v49, 4  ;;  %v903_v54 = vsel %vm876_vm5, %v895_v61, %v902_v40  ;;  %v923_v55 = vperm.slane %v915_v45, %v2964_v5 }
 0x25d   : > { %v981_v57 = vsel %vm876_vm5, 0.0, %v980_v48  ;;  %v984_v58 = vrot.slane %v3002_v47, 4  ;;  %v3014_v59 = vsel %vm876_vm5, 0.0, %v3005_v50  ;;  %v911_v60 = vperm.slane %v903_v54, %v2964_v5 }
 0x25e   : > { %v1058_v63 = vrot.slane %v3014_v59, 4  ;;  %v924_v1 = vrot.slane %v2995_v44, 4  ;;  %v928_v61 = vrot.slane %v2999_v46, 4  ;;  %v3020_v2 = vrot.slane %v923_v55, 4 }
 0x25f   : > { %v3022_v3 = vrot.slane %v911_v60, 4  ;;  %v2502_v4 = vunpack.i.h.bf16 %v2500_v56  ;;  %v2501_v7 = vunpack.i.l.bf16 %v2500_v56  ;;  %v2507_v8 = vunpack.i.h.bf16 %v2505_v62 }
 0x260   : > { %v3025_v9 = vsel %vm876_vm5, 0.0, %v924_v1  ;;  %v929_v10 = vsel %vm876_vm5, 0.0, %v928_v61  ;;  %v931_v13 = vsel %vm876_vm5, 0.0, %v3020_v2  ;;  %v2506_v14 = vunpack.i.l.bf16 %v2505_v62 }
 0x261   : > { %v3032_v15 = vsel %vm876_vm5, 0.0, %v3022_v3  ;;  %v1004_v16 = vrot.slane %v931_v13, 4  ;;  %v1172_v17 = vrot.slane %v2502_v4, 4  ;;  %v1175_v18 = vsel %vm876_vm5, %v2502_v4, %v1174_v20 }
 0x262   : > { %v993_v19 = vrot.slane %v3032_v15, 4  ;;  %v1183_v21 = vperm.slane %v1175_v18, %v2951_v51  ;;  %v1116_v22 = vrot.slane %v2501_v7, 4  ;;  %v1119_v23 = vsel %vm876_vm5, %v2501_v7, %v1118_v11 }
 0x263   : > { %v3041_v25 = vsel %vm876_vm5, %v1004_v16, %v929_v10  ;;  %v1173_v26 = vsel %vm876_vm5, %v1172_v17, %v2946_v43  ;;  %v1127_v27 = vperm.slane %v1119_v23, %v2951_v51  ;;  %v1186_v28 = vrot.slane %v2507_v8, 4 }
 0x264   : > { %v1179_v20 = vperm.slane %v1173_v26, %v2951_v51  ;;  %v1210_v29 = vrot.slane %v1183_v21, 4  ;;  %v1117_v30 = vsel %vm876_vm5, %v1116_v22, %v2944_v42  ;;  %v1130_v31 = vrot.slane %v2506_v14, 4 }
 0x265   : > { %v1123_v33 = vperm.slane %v1117_v30, %v2951_v51  ;;  %v1154_v34 = vrot.slane %v1127_v27, 4  ;;  %v1129_v11 = vsel %vm876_vm5, %v2979_v24, %v2506_v14  ;;  %v1185_v35 = vsel %vm876_vm5, %v1184_v32, %v2507_v8 }
 0x266   : > { %v1198_v36 = vrot.slane %v1179_v20, 4  ;;  %v1131_v43 = vsel %vm876_vm5, %v2511_v6, %v1130_v31  ;;  %v1135_v37 = vperm.slane %v1129_v11, %v2951_v51  ;;  %v1187_v42 = vsel %vm876_vm5, %v2512_v12, %v1186_v28 }
 0x267   : > { %v1142_v38 = vrot.slane %v1123_v33, 4  ;;  %v1139_v39 = vperm.slane %v1131_v43, %v2951_v51  ;;  %v1191_v40 = vperm.slane %v1185_v35, %v2951_v51  ;;  %v1195_v24 = vperm.slane %v1187_v42, %v2951_v51 }
 0x268   : > { %v1140_v41 = vrot.slane %v1135_v37, 4  ;;  %v3064_v32 = vsel %vm876_vm5, 0.0, %v984_v58  ;;  %v3067_v45 = vperm.slane %v1042_v52, %v2951_v51  ;;  %v3070_v6 = vsel %vm876_vm5, %v1047_v53, %v981_v57 }
 0x269   : > { %v1143_v0 = vsel %vm876_vm5, %v1135_v37, %v1142_v38  ;;  %v1152_v12 = vrot.slane %v1139_v39, 4  ;;  %v1155_v48 = vsel %vm876_vm5, %v1139_v39, %v1154_v34  ;;  %v1196_v49 = vrot.slane %v1191_v40, 4 }
 0x26a   : > { %v1141_v54 = vsel %vm876_vm5, %v1140_v41, %v1123_v33  ;;  %v1151_v55 = vperm.slane %v1143_v0, %v2964_v5  ;;  %v1163_v56 = vperm.slane %v1155_v48, %v2964_v5  ;;  %v1199_v58 = vsel %vm876_vm5, %v1191_v40, %v1198_v36 }
 0x26b   : > { %v1147_v52 = vperm.slane %v1141_v54, %v2964_v5  ;;  %v1153_v60 = vsel %vm876_vm5, %v1152_v12, %v1127_v27  ;;  %v1197_v53 = vsel %vm876_vm5, %v1196_v49, %v1179_v20  ;;  %v1207_v57 = vperm.slane %v1199_v58, %v2964_v5 }
 0x26c   : > { %v1159_v62 = vperm.slane %v1153_v60, %v2964_v5  ;;  %v1166_v1 = vrot.slane %v1151_v55, 4  ;;  %v1170_v61 = vrot.slane %v1163_v56, 4  ;;  %v1203_v4 = vperm.slane %v1197_v53, %v2964_v5 }
 0x26d   : > { %v1164_v7 = vrot.slane %v1147_v52, 4  ;;  %v1208_v8 = vrot.slane %v1195_v24, 4  ;;  %v1211_v10 = vsel %vm876_vm5, %v1195_v24, %v1210_v29  ;;  %v1222_v13 = vrot.slane %v1207_v57, 4 }
 0x26e   : > { %v1167_v14 = vsel %vm876_vm5, 0.0, %v1166_v1  ;;  %v1168_v16 = vrot.slane %v1159_v62, 4  ;;  %v1171_v17 = vsel %vm876_vm5, 0.0, %v1170_v61  ;;  %v1219_v18 = vperm.slane %v1211_v10, %v2964_v5 }
 0x26f   : > { %v1165_v22 = vsel %vm876_vm5, 0.0, %v1164_v7  ;;  %v1209_v23 = vsel %vm876_vm5, %v1208_v8, %v1183_v21  ;;  %v1220_v26 = vrot.slane %v1203_v4, 4  ;;  %v1223_v27 = vsel %vm876_vm5, 0.0, %v1222_v13 }
 0x270   : > { %v1169_v28 = vsel %vm876_vm5, 0.0, %v1168_v16  ;;  %v1215_v20 = vperm.slane %v1209_v23, %v2964_v5  ;;  %v1226_v29 = vrot.slane %v1219_v18, 4  ;;  %v1228_v30 = vsel %vm876_vm5, %v1166_v1, %v1147_v52 }
 0x271   : > { %v1221_v31 = vsel %vm876_vm5, 0.0, %v1220_v26  ;;  %v1232_v33 = vperm.slane %v1228_v30, %v2951_v51  ;;  %v1233_v34 = vrot.slane %v1167_v14, 4  ;;  %v1239_v11 = vsel %vm876_vm5, %v1170_v61, %v1159_v62 }
 0x272   : > { %v1224_v35 = vrot.slane %v1215_v20, 4  ;;  %v1227_v21 = vsel %vm876_vm5, 0.0, %v1226_v29  ;;  %v1243_v36 = vperm.slane %v1239_v11, %v2951_v51  ;;  %v1244_v43 = vrot.slane %v1171_v17, 4 }
 0x273   : > { %v1234_v37 = vsel %vm876_vm5, %v1233_v34, %v1165_v22  ;;  %v1252_v42 = vrot.slane %v1232_v33, 4  ;;  %v1282_v38 = vsel %vm876_vm5, %v1222_v13, %v1203_v4  ;;  %v1287_v39 = vrot.slane %v1223_v27, 4 }
 0x274   : > { %v1225_v40 = vsel %vm876_vm5, 0.0, %v1224_v35  ;;  %v1238_v24 = vperm.slane %v1234_v37, %v2951_v51  ;;  %v1245_v41 = vsel %vm876_vm5, %v1244_v43, %v1169_v28  ;;  %v1264_v0 = vrot.slane %v1243_v36, 4 }
 0x275   : > { %v1249_v12 = vperm.slane %v1245_v41, %v2951_v51  ;;  %v1286_v48 = vperm.slane %v1282_v38, %v2951_v51  ;;  %v1288_v49 = vsel %vm876_vm5, %v1287_v39, %v1221_v31  ;;  %v1293_v54 = vsel %vm876_vm5, %v1226_v29, %v1215_v20 }
 0x276   : > { %v1250_v55 = vrot.slane %v1238_v24, 4  ;;  %v1253_v56 = vsel %vm876_vm5, %v1238_v24, %v1252_v42  ;;  %v1292_v58 = vperm.slane %v1288_v49, %v2951_v51  ;;  %v1297_v52 = vperm.slane %v1293_v54, %v2951_v51 }
 0x277   : > { %v1261_v60 = vperm.slane %v1253_v56, %v2964_v5  ;;  %v1262_v53 = vrot.slane %v1249_v12, 4  ;;  %v1265_v57 = vsel %vm876_vm5, %v1249_v12, %v1264_v0  ;;  %v1298_v62 = vrot.slane %v1227_v21, 4 }
 0x278   : > { %v1251_v1 = vsel %vm876_vm5, %v1250_v55, %v1232_v33  ;;  %v1273_v61 = vperm.slane %v1265_v57, %v2964_v5  ;;  %v1304_v4 = vrot.slane %v1292_v58, 4  ;;  %v1306_v7 = vrot.slane %v1286_v48, 4 }
 0x279   : > { %v1257_v8 = vperm.slane %v1251_v1, %v2964_v5  ;;  %v1263_v10 = vsel %vm876_vm5, %v1262_v53, %v1243_v36  ;;  %v1280_v13 = vrot.slane %v1261_v60, 4  ;;  %v1299_v14 = vsel %vm876_vm5, %v1298_v62, %v1225_v40 }
 0x27a   : > { %v1269_v16 = vperm.slane %v1263_v10, %v2964_v5  ;;  %v1278_v17 = vrot.slane %v1273_v61, 4  ;;  %v1303_v18 = vperm.slane %v1299_v14, %v2951_v51  ;;  %v1305_v22 = vsel %vm876_vm5, %v1304_v4, %v1286_v48 }
 0x27b   : > { %v1276_v23 = vrot.slane %v1257_v8, 4  ;;  %v3122_v26 = vsel %vm876_vm5, %v1273_v61, %v1280_v13  ;;  %v1307_v27 = vsel %vm876_vm5, %v1292_v58, %v1306_v7  ;;  %v1311_v28 = vperm.slane %v1305_v22, %v2964_v5 }
 0x27c   : > { %v1274_v20 = vrot.slane %v1269_v16, 4  ;;  %v3127_v29 = vsel %vm876_vm5, %v1278_v17, %v1261_v60  ;;  %v1315_v30 = vperm.slane %v1307_v27, %v2964_v5  ;;  %v1316_v31 = vrot.slane %v1303_v18, 4 }
 0x27d   : > { %v3131_v33 = vsel %vm876_vm5, %v1269_v16, %v1276_v23  ;;  %v1318_v34 = vrot.slane %v1297_v52, 4  ;;  %v1330_v11 = vrot.slane %v1311_v28, 4  ;;  %v1052_v35 = vperm.slane %v3070_v6, %v2951_v51 }
 0x27e   : > { %v3136_v21 = vsel %vm876_vm5, %v1274_v20, %v1257_v8  ;;  %v1317_v36 = vsel %vm876_vm5, %v1316_v31, %v1297_v52  ;;  %v1334_v43 = vrot.slane %v1315_v30, 4  ;;  %v1053_v37 = vsel %vm876_vm5, %v3005_v50, %v3002_v47 }
 0x27f   : > { %v1319_v42 = vsel %vm876_vm5, %v1303_v18, %v1318_v34  ;;  %v1323_v38 = vperm.slane %v1317_v36, %v2964_v5  ;;  %v1057_v39 = vperm.slane %v1053_v37, %v2951_v51  ;;  %v1059_v6 = vsel %vm876_vm5, %v1058_v63, %v3064_v32  ;;  %v1336_v37 = vld [vmem:[#allocation2] sm:$0xff] }
 0x280   : > { %v1327_v40 = vperm.slane %v1319_v42, %v2964_v5  ;;  %v1063_v24 = vperm.slane %v1059_v6, %v2951_v51  ;;  %v1064_v41 = vrot.slane %v1052_v35, 4  ;;  %v988_v50 = vsel %vm876_vm5, %v3022_v3, %v2995_v44  ;;  %v1339_v6 = vld [vmem:[#allocation2 + $0x18] sm:$0xff] }
 0x281   : > { %v1328_v0 = vrot.slane %v1323_v38, 4  ;;  %v3152_v47 = vsel %vm876_vm5, %v1323_v38, %v1330_v11  ;;  %v994_v59 = vsel %vm876_vm5, %v993_v19, %v3025_v9  ;;  %v992_v44 = vperm.slane %v988_v50, %v2951_v51 }
 0x282   : > { %v1332_v63 = vrot.slane %v1327_v40, 4  ;;  %v3162_v32 = vsel %vm876_vm5, %v1327_v40, %v1334_v43  ;;  %v1065_v12 = vsel %vm876_vm5, %v1064_v41, %v3067_v45  ;;  %v1076_v48 = vrot.slane %v1063_v24, 4  ;;  %v1338_v40 = vld [vmem:[#allocation2 + $0x10] sm:$0xff] }
 0x283   : > { %v3167_v49 = vsel %vm876_vm5, %v1328_v0, %v1311_v28  ;;  %v1071_v54 = vperm.slane %v1065_v12, %v2964_v5  ;;  %v998_v3 = vperm.slane %v994_v59, %v2951_v51  ;;  %v999_v19 = vsel %vm876_vm5, %v3020_v2, %v2999_v46 }
 0x284   : > { %v3173_v15 = vsel %vm876_vm5, %v1332_v63, %v1315_v30  ;;  %v1077_v9 = vsel %vm876_vm5, %v1076_v48, %v1057_v39  ;;  %v1009_v55 = vperm.slane %v3041_v25, %v2951_v51  ;;  %v1003_v52 = vperm.slane %v999_v19, %v2951_v51 }
 0x285   : > { %v1083_v56 = vperm.slane %v1077_v9, %v2964_v5  ;;  %v1090_v58 = vrot.slane %v1071_v54, 4  ;;  %v1010_v60 = vrot.slane %v998_v3, 4  ;;  %v1066_v57 = vrot.slane %v3067_v45, 4 }
 0x286   : > { %v1022_v53 = vrot.slane %v1009_v55, 4  ;;  %v1078_v62 = vrot.slane %v1057_v39, 4  ;;  %v1012_v1 = vrot.slane %v992_v44, 4  ;;  %v1024_v46 = vrot.slane %v1003_v52, 4 }
 0x287   : > { %v1091_v61 = vsel %vm876_vm5, %v1083_v56, %v1090_v58  ;;  %v1088_v4 = vrot.slane %v1083_v56, 4  ;;  %v1011_v7 = vsel %vm876_vm5, %v1010_v60, %v992_v44  ;;  %v1067_v8 = vsel %vm876_vm5, %v1052_v35, %v1066_v57  ;;  %v1337_v35 = vld [vmem:[#allocation2 + $0x8] sm:$0xff] }
 0x288   : > { %2382 = vmatpush.xpose.msk.msra.mxu3 %vm1340_vm6, %v1091_v61  ;;  %v1017_v2 = vperm.slane %v1011_v7, %v2964_v5  ;;  %v1023_v25 = vsel %vm876_vm5, %v1022_v53, %v1003_v52  ;;  %v1079_v10 = vsel %vm876_vm5, %v1063_v24, %v1078_v62  ;;  %v1075_v14 = vperm.slane %v1067_v8, %v2964_v5 }
 0x289   : > { %v1089_v45 = vsel %vm876_vm5, %v1088_v4, %v1071_v54  ;;  %v1029_v13 = vperm.slane %v1023_v25, %v2964_v5  ;;  %v1087_v16 = vperm.slane %v1079_v10, %v2964_v5  ;;  %v1013_v18 = vsel %vm876_vm5, %v998_v3, %v1012_v1 }
 0x28a   : > { %2379 = vmatpush.xpose.msk.msra.mxu2 %vm1340_vm6, %v1089_v45  ;;  %v1036_v17 = vrot.slane %v1017_v2, 4  ;;  %v1025_v22 = vsel %vm876_vm5, %v1009_v55, %v1024_v46  ;;  %v1094_v23 = vrot.slane %v1075_v14, 4  ;;  %v1021_v20 = vperm.slane %v1013_v18, %v2964_v5 }
 0x28b   : > { %v1034_v27 = vrot.slane %v1029_v13, 4  ;;  %v1092_v28 = vrot.slane %v1087_v16, 4  ;;  %v1033_v31 = vperm.slane %v1025_v22, %v2964_v5 }
 0x28c   : > { %v1037_v30 = vsel %vm876_vm5, %v1029_v13, %v1036_v17  ;;  %v1095_v34 = vsel %vm876_vm5, %v1087_v16, %v1094_v23  ;;  %v1040_v36 = vrot.slane %v1021_v20, 4 }
 0x28d   : > { %2383 = vmatpush.xpose.msk.msra.mxu3 %vm1340_vm6, %v1037_v30  ;;  %v1035_v11 = vsel %vm876_vm5, %v1034_v27, %v1017_v2  ;;  %v1093_v43 = vsel %vm876_vm5, %v1092_v28, %v1075_v14  ;;  %v1038_v42 = vrot.slane %v1033_v31, 4 }
 0x28e   : > { %2380 = vmatpush.xpose.msk.msra.mxu2 %vm1340_vm6, %v1035_v11  ;;  %v1041_v38 = vsel %vm876_vm5, %v1033_v31, %v1040_v36 }
 0x28f   : > { %v1039_v39 = vsel %vm876_vm5, %v1038_v42, %v1021_v20 }
 0x290   : > { %2384 = vmatmul.msk.f32.vlgmr.msra.gmra.mxu3 %vm1340_vm6, %v1337_v35 }
 0x291   : > { %2388 = vmatpush.xpose.msk.msrb.mxu3 %vm1340_vm6, %v1095_v34  ;;  %2381 = vmatmul.msk.f32.vlgmr.msra.gmra.mxu2 %vm1340_vm6, %v1336_v37 }
 0x292   : > { %2385 = vmatpush.xpose.msk.msrb.mxu2 %vm1340_vm6, %v1093_v43 }
 0x295   : > { %2389 = vmatpush.xpose.msk.msrb.mxu3 %vm1340_vm6, %v1041_v38 }
 0x296   : > { %2386 = vmatpush.xpose.msk.msrb.mxu2 %vm1340_vm6, %v1039_v39 }
 0x298   : > { %2390 = vmatmul.msk.f32.vlgmr.msrb.gmra.mxu3 %vm1340_vm6, %v1339_v6 }
 0x299   : > { %2387 = vmatmul.msk.f32.vlgmr.msrb.gmra.mxu2 %vm1340_vm6, %v1338_v40 }
 0x313   : > { %v3216_v24 = vpop.f32.mrf.mxu3 }
 0x314   : > { %v3218_v41 = vpop.f32.mrf.mxu2 }
 0x318   : > { %1460 = sbr.rel (%p2391_p1) target bundleno = 1180 (0x49c), region = 84 }
 0x31b   : > { %v3220_v0 = vpop.f32.mrf.mxu3 }
 0x31c   : > { %v3222_v50 = vpop.f32.mrf.mxu2 }
 0x31d   : > { %vm1465_vm7 = vcmask 130048   ;;  %1618 = vmatpush.msra.mxu2 %v3173_v15  ;;  %1641 = vmatpush.msra.mxu3 %v3162_v32  ;;  %v2676_v54 = vmov 0   ;;  %v1463_v44 = vld [vmem:[#allocation3 + $0x10] sm:$0xff]  ;;  %v1461_v3 = vld [vmem:[#allocation3] sm:$0xff]  ;;  %vm1550_vm8 = vcmask 7168   ;;  %v1464_v53 = vld [vmem:[#allocation3 + $0x18] sm:$0xff] }
 0x31e   : > { %v1472_v59 = vsel %vm1465_vm7, %v3222_v50, -inf  ;;  %v1466_v63 = vsel %vm1465_vm7, %v3218_v41, -inf  ;;  %1572 = vmatpush.msra.mxu0 %v3167_v49  ;;  %1595 = vmatpush.msra.mxu1 %v3152_v47  ;;  %v1475_v12 = vsel %vm1465_vm7, %v3220_v0, -inf  ;;  %v1469_v48 = vsel %vm1465_vm7, %v3216_v24, -inf  ;;  %v1462_v57 = vld [vmem:[#allocation3 + $0x8] sm:$0xff] }
 0x31f   : > { %1473 = vmax.xlane.f32.xlu0 %v1472_v59  ;;  %1467 = vmax.xlane.f32.xlu1 %v1466_v63 }
 0x320   : > { %1619 = vmatpush.msra.mxu2 %v3127_v29  ;;  %1642 = vmatpush.msra.mxu3 %v3122_v26 }
 0x321   : > { %1573 = vmatpush.msra.mxu0 %v3136_v21  ;;  %1596 = vmatpush.msra.mxu1 %v3131_v33 }
 0x322   : > { %2516 = vset.pattern.permute.xlu0 %v2676_v54  ;;  %2515 = vset.pattern.permute.xlu2 %v2676_v54 }
 0x323   : > { %2517 = vset.pattern.permute.xlu1 %v2676_v54 }
 0x327   : > { %1476 = vmax.xlane.f32.xlu0 %v1475_v12  ;;  %1470 = vmax.xlane.f32.xlu1 %v1469_v48  ;;  %v1528_v12 = vld [vmem:[#allocation4 + $0x10] sm:$0xff] }
 0x392   : > { %v1474_v9 = vpop.xlane.xlu0 %1473  ;;  %v1468_v19 = vpop.xlane.xlu1 %1467 }
 0x393   : > { %v1480_v55 = vmax.f32 %v1463_v44, %v1474_v9  ;;  %v1478_v56 = vmax.f32 %v1461_v3, %v1468_v19  ;;  %v1529_v9 = vld [vmem:[#allocation4 + $0x18] sm:$0xff] }
 0x395   : > { %v1484_v58 = vsub.f32 %v1463_v44, %v1480_v55  ;;  %1685 = vst.msk [vmem:[#allocation3 + $0x10] sm:$0xff] %vm1550_vm8, %v1480_v55  ;;  %1506 = vperm.xlu2 %2515, %v1480_v55   ;;  %1496 = vperm.xlu0 %2516, %v1478_v56   ;;  %v1482_v52 = vsub.f32 %v1461_v3, %v1478_v56 }
 0x396   : > { %1683 = vst.msk [vmem:[#allocation3] sm:$0xff] %vm1550_vm8, %v1478_v56 }
 0x397   : > { %v1490_v60 = vmul.f32 1.442695, %v1484_v58  ;;  %v1486_v62 = vmul.f32 1.442695, %v1482_v52  ;;  %v1649_v58 = vld [vmem:[#allocation5 + $0x10] sm:$0xff] }
 0x399   : > { %2518 = vpow2.f32 %v1490_v60 }
 0x39a   : > { %v1477_v1 = vpop.xlane.xlu0 %1476  ;;  %v1471_v61 = vpop.xlane.xlu1 %1470  ;;  %2520 = vpow2.f32 %v1486_v62  ;;  %v1526_v62 = vld [vmem:[#allocation4] sm:$0xff] }
 0x39b   : > { %v1481_v4 = vmax.f32 %v1464_v53, %v1477_v1  ;;  %v1479_v7 = vmax.f32 %v1462_v57, %v1471_v61 }
 0x39d   : > { %1686 = vst.msk [vmem:[#allocation3 + $0x18] sm:$0xff] %vm1550_vm8, %v1481_v4  ;;  %1511 = vperm.xlu2 %2515, %v1481_v4   ;;  %1501 = vperm.xlu1 %2517, %v1479_v7   ;;  %v1483_v46 = vsub.f32 %v1462_v57, %v1479_v7  ;;  %v1485_v10 = vsub.f32 %v1464_v53, %v1481_v4  ;;  %v1650_v57 = vld [vmem:[#allocation5 + $0x18] sm:$0xff] }
 0x39e   : > { %1684 = vst.msk [vmem:[#allocation3 + $0x8] sm:$0xff] %vm1550_vm8, %v1479_v7 }
 0x39f   : > { %v2519_v2 = vpop.eup %2518  ;;  %v1488_v25 = vmul.f32 1.442695, %v1483_v46  ;;  %v1492_v45 = vmul.f32 1.442695, %v1485_v10  ;;  %v1647_v10 = vld [vmem:[#allocation5] sm:$0xff] }
 0x3a0   : > { %1663 = vperm.xlu0 %2516, %v2519_v2   ;;  %v3245_v8 = vpop.eup %2520  ;;  %v1532_v48 = vmul.f32 %v2519_v2, %v1528_v12 }
 0x3a1   : > { %2522 = vpow2.f32 %v1488_v25  ;;  %v1530_v4 = vmul.f32 %v3245_v8, %v1526_v62  ;;  %v1527_v25 = vld [vmem:[#allocation4 + $0x8] sm:$0xff] }
 0x3a2   : > { %2524 = vpow2.f32 %v1492_v45 }
 0x3a5   : > { %1653 = vperm.xlu1 %2517, %v3245_v8   ;;  %v1648_v8 = vld [vmem:[#allocation5 + $0x8] sm:$0xff] }
 0x3a7   : > { %v3248_v13 = vpop.eup %2522 }
 0x3a8   : > { %v2525_v14 = vpop.eup %2524  ;;  %v1531_v45 = vmul.f32 %v3248_v13, %v1527_v25 }
 0x3a9   : > { %v1533_v19 = vmul.f32 %v2525_v14, %v1529_v9 }
 0x3ad   : > { %1658 = vperm.xlu1 %2517, %v3248_v13  }
 0x3b5   : > { %1668 = vperm.xlu1 %2517, %v2525_v14  }
 0x3ef   : > { %v1507_v16 = vpop.permute.xlu2 %1506 }
 0x3f0   : > { %v1516_v17 = vsub.f32 %v3222_v50, %v1507_v16 }
 0x3f2   : > { %v1522_v18 = vmul.f32 1.442695, %v1516_v17 }
 0x3f4   : > { %2526 = vpow2.f32 %v1522_v18 }
 0x3f7   : > { %v1512_v22 = vpop.permute.xlu2 %1511 }
 0x3f8   : > { %v1517_v23 = vsub.f32 %v3220_v0, %v1512_v22 }
 0x3fa   : > { %v2527_v27 = vpop.eup %2526  ;;  %v1524_v28 = vmul.f32 1.442695, %v1517_v23 }
 0x3fb   : > { %2394 = vmatmul.msk.f32.vlgmr.msra.gmra.mxu2 %vm1465_vm7, %v2527_v27  ;;  %v1540_v20 = vsel %vm1465_vm7, %v2527_v27, 0.0 }
 0x3fc   : > { %2528 = vpow2.f32 %v1524_v28  ;;  %1541 = vadd.xlane.f32.xlu0 %v1540_v20 }
 0x402   : > { %v2529_v30 = vpop.eup %2528 }
 0x403   : > { %2395 = vmatmul.msk.f32.vlgmr.msra.gmra.mxu3 %vm1465_vm7, %v2529_v30  ;;  %v1543_v31 = vsel %vm1465_vm7, %v2529_v30, 0.0 }
 0x404   : > { %1544 = vadd.xlane.f32.xlu1 %v1543_v31 }
 0x407   : > { %v1497_v34 = vpop.permute.xlu0 %1496 }
 0x408   : > { %v1514_v11 = vsub.f32 %v3218_v41, %v1497_v34 }
 0x40a   : > { %v1518_v35 = vmul.f32 1.442695, %v1514_v11 }
 0x40c   : > { %2530 = vpow2.f32 %v1518_v35 }
 0x40f   : > { %v1502_v36 = vpop.permute.xlu1 %1501 }
 0x410   : > { %v1515_v43 = vsub.f32 %v3216_v24, %v1502_v36 }
 0x412   : > { %v2531_v37 = vpop.eup %2530  ;;  %v1520_v42 = vmul.f32 1.442695, %v1515_v43  ;;  %v1664_v63 = vpop.permute.xlu0 %1663 }
 0x413   : > { %2392 = vmatmul.msk.f32.vlgmr.msra.gmra.mxu0 %vm1465_vm7, %v2531_v37  ;;  %v1534_v38 = vsel %vm1465_vm7, %v2531_v37, 0.0  ;;  %v1673_v52 = vmul.f32 %v1664_v63, %v1649_v58 }
 0x414   : > { %2532 = vpow2.f32 %v1520_v42  ;;  %1535 = vadd.xlane.f32.xlu2 %v1534_v38 }
 0x417   : > { %v1654_v40 = vpop.permute.xlu1 %1653 }
 0x418   : > { %v1671_v14 = vmul.f32 %v1654_v40, %v1647_v10 }
 0x41a   : > { %v2533_v39 = vpop.eup %2532 }
 0x41b   : > { %2393 = vmatmul.msk.f32.vlgmr.msra.gmra.mxu1 %vm1465_vm7, %v2533_v39  ;;  %v1537_v6 = vsel %vm1465_vm7, %v2533_v39, 0.0 }
 0x41c   : > { %1538 = vadd.xlane.f32.xlu2 %v1537_v6 }
 0x41f   : > { %v1659_v59 = vpop.permute.xlu1 %1658 }
 0x420   : > { %v1672_v23 = vmul.f32 %v1659_v59, %v1648_v8 }
 0x427   : > { %v1669_v54 = vpop.permute.xlu1 %1668 }
 0x428   : > { %v1674_v1 = vmul.f32 %v1669_v54, %v1650_v57 }
 0x46f   : > { %v1542_v44 = vpop.xlane.xlu0 %1541 }
 0x470   : > { %v1548_v3 = vadd.f32 %v1542_v44, %v1532_v48 }
 0x472   : > { %1553 = vst.msk [vmem:[#allocation4 + $0x10] sm:$0xff] %vm1550_vm8, %v1548_v3 }
 0x477   : > { %v1545_v55 = vpop.xlane.xlu1 %1544 }
 0x478   : > { %v1549_v56 = vadd.f32 %v1545_v55, %v1533_v19 }
 0x47a   : > { %1554 = vst.msk [vmem:[#allocation4 + $0x18] sm:$0xff] %vm1550_vm8, %v1549_v56 }
 0x47e   : > { %v1621_v60 = vpop.f32.mrf.mxu2 }
 0x47f   : > { %v1677_v53 = vadd.f32 %v1673_v52, %v1621_v60 }
 0x481   : > { %1681 = vst.msk [vmem:[#allocation5 + $0x10] sm:$0xff] %vm1340_vm6, %v1677_v53 }
 0x486   : > { %v1644_v61 = vpop.f32.mrf.mxu3 }
 0x487   : > { %v1678_v7 = vadd.f32 %v1674_v1, %v1644_v61  ;;  %v1536_v46 = vpop.xlane.xlu2 %1535 }
 0x488   : > { %v1546_v2 = vadd.f32 %v1536_v46, %v1530_v4 }
 0x489   : > { %1682 = vst.msk [vmem:[#allocation5 + $0x18] sm:$0xff] %vm1340_vm6, %v1678_v7 }
 0x48a   : > { %1551 = vst.msk [vmem:[#allocation4] sm:$0xff] %vm1550_vm8, %v1546_v2 }
 0x48f   : > { %v1539_v16 = vpop.xlane.xlu2 %1538 }
 0x490   : > { %v1547_v17 = vadd.f32 %v1539_v16, %v1531_v45  ;;  %v1575_v18 = vpop.f32.mrf.mxu0 }
 0x491   : > { %v1675_v22 = vadd.f32 %v1671_v14, %v1575_v18 }
 0x492   : > { %1552 = vst.msk [vmem:[#allocation4 + $0x8] sm:$0xff] %vm1550_vm8, %v1547_v17 }
 0x493   : > { %1679 = vst.msk [vmem:[#allocation5] sm:$0xff] %vm1340_vm6, %v1675_v22 }
 0x498   : > { %v1598_v27 = vpop.f32.mrf.mxu1 }
 0x499   : > { %v1676_v28 = vadd.f32 %v1672_v23, %v1598_v27 }
 0x49b   : > { %1680 = vst.msk [vmem:[#allocation5 + $0x8] sm:$0xff] %vm1340_vm6, %v1676_v28 }
 0x49c PF: > { %p2396_p2 = scmp.ne.s32.totalorder %s2646_s16, 2 }
 0x49d   : > { %s2397_s15 = sshll.u32 (!%p2396_p2), %s2646_s16, 4  ;;  %s2678_s16 = smov (!%p2396_p2), 24  }
 0x49e   : > { %1690 = sbr.rel (%p2396_p2) target bundleno = 2226 (0x8b2), region = 88  ;;  %s2679_s17 = smov (!%p2396_p2), 16  }
 0x49f   : > { %s2680_s18 = smov (!%p2396_p2), 8   ;;  %s3474_s26 = sld [smem:[#allocation21_spill]] (!%p2396_p2) }
 0x4a0   : > { %s3475_s12 = sld [smem:[#allocation22_spill]] (!%p2396_p2) }
 0x4a3   : > { %v1691_v13 = vlaneseq  ;;  %1860 = vmatpush.msra.mxu2 %v3173_v15  ;;  %1883 = vmatpush.msra.mxu3 %v3162_v32  ;;  %v1694_v20 = vstv %s2397_s15  ;;  %vm1707_vm9 = vcmask 130048   ;;  %v2677_v34 = vmov 0   ;;  %v1706_v37 = vld [vmem:[#allocation3 + $0x18] sm:$0xff]  ;;  %v1704_v42 = vld [vmem:[#allocation3 + $0x8] sm:$0xff]  ;;  %v1770_v22 = vld [vmem:[#allocation4 + $0x10] sm:$0xff] }
 0x4a4   : > { %1814 = vmatpush.msra.mxu0 %v3167_v49  ;;  %1837 = vmatpush.msra.mxu1 %v3152_v47  ;;  %vm1792_vm11 = vcmask 7168   ;;  %v1771_v28 = vld [vmem:[#allocation4 + $0x18] sm:$0xff] }
 0x4a5   : > { %v1692_v30 = vand.u32 127, %v1691_v13  ;;  %1861 = vmatpush.msra.mxu2 %v3127_v29  ;;  %1884 = vmatpush.msra.mxu3 %v3122_v26 }
 0x4a6   : > { %1815 = vmatpush.msra.mxu0 %v3136_v21  ;;  %1838 = vmatpush.msra.mxu1 %v3131_v33 }
 0x4a7   : > { %v1695_v31 = vadd.s32 %v1694_v20, %v1692_v30  ;;  %2535 = vset.pattern.permute.xlu0 %v2677_v34  ;;  %2534 = vset.pattern.permute.xlu2 %v2677_v34 }
 0x4a8   : > { %2536 = vset.pattern.permute.xlu1 %v2677_v34 }
 0x4a9   : > { %vm1696_vm10 = vcmp.lt.s32.totalorder %v1695_v31, 40 }
 0x4aa   : > { %v1701_v15 = vsel %vm1696_vm10, %v3222_v50, -1e+30  ;;  %v1699_v32 = vsel %vm1696_vm10, %v3218_v41, -1e+30  ;;  %v1702_v29 = vsel %vm1696_vm10, %v3220_v0, -1e+30 }
 0x4ab   : > { %v1714_v49 = vsel %vm1707_vm9, %v1701_v15, -inf  ;;  %v1708_v47 = vsel %vm1707_vm9, %v1699_v32, -inf  ;;  %v1700_v26 = vsel %vm1696_vm10, %v3216_v24, -1e+30  ;;  %v1717_v21 = vsel %vm1707_vm9, %v1702_v29, -inf  ;;  %v1705_v41 = vld [vmem:[#allocation3 + $0x10] sm:$0xff] }
 0x4ac   : > { %1715 = vmax.xlane.f32.xlu0 %v1714_v49  ;;  %1709 = vmax.xlane.f32.xlu1 %v1708_v47  ;;  %v1711_v33 = vsel %vm1707_vm9, %v1700_v26, -inf  ;;  %v1703_v50 = vld [vmem:[#allocation3] sm:$0xff] }
 0x4ad   : > { %v1768_v47 = vld [vmem:[#allocation4] sm:$0xff] }
 0x4b4   : > { %1718 = vmax.xlane.f32.xlu0 %v1717_v21  ;;  %1712 = vmax.xlane.f32.xlu1 %v1711_v33 }
 0x51f   : > { %v1716_v11 = vpop.xlane.xlu0 %1715  ;;  %v1710_v35 = vpop.xlane.xlu1 %1709 }
 0x520   : > { %v1722_v36 = vmax.f32 %v1705_v41, %v1716_v11  ;;  %v1720_v43 = vmax.f32 %v1703_v50, %v1710_v35 }
 0x522   : > { %v1726_v0 = vsub.f32 %v1705_v41, %v1722_v36  ;;  %1927 = vst.msk [vmem:[#allocation3 + $0x10] sm:$0xff] %vm1792_vm11, %v1722_v36  ;;  %v1724_v24 = vsub.f32 %v1703_v50, %v1720_v43  ;;  %1748 = vperm.xlu2 %2534, %v1722_v36   ;;  %1738 = vperm.xlu0 %2535, %v1720_v43  }
 0x523   : > { %1925 = vst.msk [vmem:[#allocation3] sm:$0xff] %vm1792_vm11, %v1720_v43 }
 0x524   : > { %v1728_v2 = vmul.f32 1.442695, %v1724_v24  ;;  %v1732_v25 = vmul.f32 1.442695, %v1726_v0 }
 0x527   : > { %v1719_v38 = vpop.xlane.xlu0 %1718  ;;  %v1713_v39 = vpop.xlane.xlu1 %1712 }
 0x528   : > { %v1723_v6 = vmax.f32 %v1706_v37, %v1719_v38  ;;  %v1721_v40 = vmax.f32 %v1704_v42, %v1713_v39 }
 0x52a   : > { %v1727_v59 = vsub.f32 %v1706_v37, %v1723_v6  ;;  %1928 = vst.msk [vmem:[#allocation3 + $0x18] sm:$0xff] %vm1792_vm11, %v1723_v6  ;;  %v1725_v63 = vsub.f32 %v1704_v42, %v1721_v40  ;;  %1753 = vperm.xlu2 %2534, %v1723_v6   ;;  %1743 = vperm.xlu1 %2536, %v1721_v40   ;;  %v1769_v37 = vld [vmem:[#allocation4 + $0x8] sm:$0xff] }
 0x52b   : > { %1926 = vst.msk [vmem:[#allocation3 + $0x8] sm:$0xff] %vm1792_vm11, %v1721_v40 }
 0x52c   : > { %v1734_v45 = vmul.f32 1.442695, %v1727_v59  ;;  %v1730_v16 = vmul.f32 1.442695, %v1725_v63 }
 0x57c   : > { %v1749_v12 = vpop.permute.xlu2 %1748 }
 0x57d   : > { %v1758_v48 = vsub.f32 %v1701_v15, %v1749_v12 }
 0x57f   : > { %v1764_v54 = vmul.f32 1.442695, %v1758_v48 }
 0x581   : > { %2540 = vpow2.f32 %v1764_v54 }
 0x584   : > { %v1754_v44 = vpop.permute.xlu2 %1753 }
 0x585   : > { %v1759_v3 = vsub.f32 %v1702_v29, %v1754_v44 }
 0x587   : > { %v2541_v9 = vpop.eup %2540  ;;  %v1766_v19 = vmul.f32 1.442695, %v1759_v3 }
 0x588   : > { %2400 = vmatmul.msk.f32.vlgmr.msra.gmra.mxu2 %vm1707_vm9, %v2541_v9  ;;  %v1782_v55 = vsel %vm1707_vm9, %v2541_v9, 0.0  ;;  %v1891_v9 = vld [vmem:[#allocation5 + $0x10] sm:$0xff] }
 0x589   : > { %2542 = vpow2.f32 %v1766_v19  ;;  %1783 = vadd.xlane.f32.xlu2 %v1782_v55 }
 0x58f   : > { %v2543_v56 = vpop.eup %2542 }
 0x590   : > { %2401 = vmatmul.msk.f32.vlgmr.msra.gmra.mxu3 %vm1707_vm9, %v2543_v56  ;;  %v1785_v58 = vsel %vm1707_vm9, %v2543_v56, 0.0 }
 0x591   : > { %1786 = vadd.xlane.f32.xlu0 %v1785_v58 }
 0x594   : > { %v1739_v52 = vpop.permute.xlu0 %1738 }
 0x595   : > { %v1756_v60 = vsub.f32 %v1699_v32, %v1739_v52 }
 0x597   : > { %v1760_v53 = vmul.f32 1.442695, %v1756_v60 }
 0x599   : > { %2544 = vpow2.f32 %v1760_v53 }
 0x59c   : > { %v1744_v57 = vpop.permute.xlu1 %1743 }
 0x59d   : > { %v1757_v62 = vsub.f32 %v1700_v26, %v1744_v57 }
 0x59f   : > { %v2545_v1 = vpop.eup %2544  ;;  %v1762_v61 = vmul.f32 1.442695, %v1757_v62 }
 0x5a0   : > { %v1776_v4 = vsel %vm1707_vm9, %v2545_v1, 0.0  ;;  %2398 = vmatmul.msk.f32.vlgmr.msra.gmra.mxu0 %vm1707_vm9, %v2545_v1  ;;  %v1892_v1 = vld [vmem:[#allocation5 + $0x18] sm:$0xff] }
 0x5a1   : > { %2546 = vpow2.f32 %v1762_v61  ;;  %1777 = vadd.xlane.f32.xlu1 %v1776_v4  ;;  %v1889_v61 = vld [vmem:[#allocation5] sm:$0xff] }
 0x5a2   : > { %2548 = vpow2.f32 %v1728_v2 }
 0x5a3   : > { %2550 = vpow2.f32 %v1732_v25 }
 0x5a4   : > { %2552 = vpow2.f32 %v1734_v45 }
 0x5a5   : > { %2554 = vpow2.f32 %v1730_v16 }
 0x5a7   : > { %v2547_v7 = vpop.eup %2546 }
 0x5a8   : > { %v1779_v46 = vsel %vm1707_vm9, %v2547_v7, 0.0  ;;  %2399 = vmatmul.msk.f32.vlgmr.msra.gmra.mxu1 %vm1707_vm9, %v2547_v7  ;;  %v2549_v10 = vpop.eup %2548 }
 0x5a9   : > { %1780 = vadd.xlane.f32.xlu2 %v1779_v46  ;;  %v2551_v14 = vpop.eup %2550  ;;  %v1772_v34 = vmul.f32 %v2549_v10, %v1768_v47 }
 0x5aa   : > { %v2553_v17 = vpop.eup %2552  ;;  %v1774_v8 = vmul.f32 %v2551_v14, %v1770_v22 }
 0x5ab   : > { %v2555_v18 = vpop.eup %2554  ;;  %v1775_v13 = vmul.f32 %v2553_v17, %v1771_v28 }
 0x5ac   : > { %v1773_v40 = vmul.f32 %v2555_v18, %v1769_v37 }
 0x5ba   : > { %1895 = vperm.xlu1 %2536, %v2549_v10  }
 0x5c1   : > { %1905 = vperm.xlu2 %2534, %v2551_v14  }
 0x5c9   : > { %1910 = vperm.xlu2 %2534, %v2553_v17  }
 0x5d1   : > { %1900 = vperm.xlu2 %2534, %v2555_v18  }
 0x5fc   : > { %v1784_v23 = vpop.xlane.xlu2 %1783 }
 0x5fd   : > { %v1790_v27 = vadd.f32 %v1784_v23, %v1774_v8 }
 0x5ff   : > { %1795 = vst.msk [vmem:[#allocation4 + $0x10] sm:$0xff] %vm1792_vm11, %v1790_v27 }
 0x604   : > { %v1787_v20 = vpop.xlane.xlu0 %1786 }
 0x605   : > { %v1791_v30 = vadd.f32 %v1787_v20, %v1775_v13 }
 0x606   : > { %v1931_v31 = vld [vmem:[#allocation4 + $0x10] sm:$0xff] }
 0x607   : > { %1796 = vst.msk [vmem:[#allocation4 + $0x18] sm:$0xff] %vm1792_vm11, %v1791_v30  ;;  %2556 = vrcp.f32 %v1931_v31  ;;  %v1972_v26 = vand.u32 2147483648, %v1931_v31  ;;  %v1970_v33 = vand.u32 2147483647, %v1931_v31  ;;  %vm1966_vm13 = vweird.f32 %v1931_v31  ;;  %v1890_v30 = vld [vmem:[#allocation5 + $0x8] sm:$0xff] }
 0x609   : > { %v1973_v36 = vor.u32 1.1754944e-38, %v1972_v26  ;;  %vm1971_vm15 = vcmp.eq.f32.partialorder %v1970_v33, 8.507059e+37 }
 0x60b   : > { %v1863_v58 = vpop.f32.mrf.mxu2 }
 0x60d   : > { %v2557_v15 = vpop.eup %2556 }
 0x60e   : > { %v1962_v32 = vmul.f32 %v2557_v15, %v1931_v31  ;;  %v1932_v49 = vld [vmem:[#allocation4 + $0x18] sm:$0xff]  ;;  %vm1967_vm12 = vweird.f32 %v2557_v15 }
 0x60f   : > { %2558 = vrcp.f32 %v1932_v49  ;;  %vm1968_vm14 = vmor %vm1966_vm13, %vm1967_vm12  ;;  %v1986_v38 = vand.u32 2147483648, %v1932_v49  ;;  %v1984_v6 = vand.u32 2147483647, %v1932_v49  ;;  %vm1980_vm1 = vweird.f32 %v1932_v49 }
 0x610   : > { %v1963_v29 = vsub.f32 1.0, %v1962_v32 }
 0x611   : > { %v1987_v48 = vor.u32 1.1754944e-38, %v1986_v38  ;;  %vm1985_vm3 = vcmp.eq.f32.partialorder %v1984_v6, 8.507059e+37 }
 0x612   : > { %v1964_v21 = vmul.f32 %v2557_v15, %v1963_v29 }
 0x613   : > { %v1886_v17 = vpop.f32.mrf.mxu3 }
 0x614   : > { %v1778_v41 = vpop.xlane.xlu1 %1777  ;;  %v1965_v50 = vadd.f32 %v2557_v15, %v1964_v21 }
 0x615   : > { %v2559_v11 = vpop.eup %2558  ;;  %v1788_v35 = vadd.f32 %v1778_v41, %v1772_v34 }
 0x616   : > { %v1969_v43 = vsel %vm1968_vm14, %v2557_v15, %v1965_v50  ;;  %v1976_v0 = vmul.f32 %v2559_v11, %v1932_v49  ;;  %vm1981_vm0 = vweird.f32 %v2559_v11 }
 0x617   : > { %1793 = vst.msk [vmem:[#allocation4] sm:$0xff] %vm1792_vm11, %v1788_v35  ;;  %v1974_v24 = vsel %vm1971_vm15, %v1973_v36, %v1969_v43  ;;  %vm1982_vm2 = vmor %vm1980_vm1, %vm1981_vm0 }
 0x618   : > { %2005 = vperm.xlu0 %2535, %v1974_v24   ;;  %v1977_v42 = vsub.f32 1.0, %v1976_v0 }
 0x61a   : > { %v1978_v39 = vmul.f32 %v2559_v11, %v1977_v42 }
 0x61c   : > { %v1781_v59 = vpop.xlane.xlu2 %1780  ;;  %v1979_v63 = vadd.f32 %v2559_v11, %v1978_v39 }
 0x61d   : > { %v1789_v12 = vadd.f32 %v1781_v59, %v1773_v40  ;;  %v1817_v18 = vpop.f32.mrf.mxu0 }
 0x61e   : > { %v1983_v54 = vsel %vm1982_vm2, %v2559_v11, %v1979_v63  ;;  %v1929_v44 = vld [vmem:[#allocation4] sm:$0xff] }
 0x61f   : > { %1794 = vst.msk [vmem:[#allocation4 + $0x8] sm:$0xff] %vm1792_vm11, %v1789_v12  ;;  %v1988_v3 = vsel %vm1985_vm3, %v1987_v48, %v1983_v54  ;;  %2560 = vrcp.f32 %v1929_v44  ;;  %v1944_v62 = vand.u32 2147483648, %v1929_v44  ;;  %v1942_v7 = vand.u32 2147483647, %v1929_v44 }
 0x620   : > { %2010 = vperm.xlu1 %2536, %v1988_v3   ;;  %vm1938_vm8 = vweird.f32 %v1929_v44 }
 0x621   : > { %v1945_v16 = vor.u32 1.1754944e-38, %v1944_v62  ;;  %vm1943_vm11 = vcmp.eq.f32.partialorder %v1942_v7, 8.507059e+37 }
 0x624   : > { %v1906_v19 = vpop.permute.xlu2 %1905 }
 0x625   : > { %v2561_v55 = vpop.eup %2560  ;;  %v1915_v56 = vmul.f32 %v1906_v19, %v1891_v9  ;;  %v1840_v26 = vpop.f32.mrf.mxu1 }
 0x626   : > { %v1934_v52 = vmul.f32 %v2561_v55, %v1929_v44  ;;  %v1930_v60 = vld [vmem:[#allocation4 + $0x8] sm:$0xff]  ;;  %vm1939_vm7 = vweird.f32 %v2561_v55 }
 0x627   : > { %v1919_v53 = vadd.f32 %v1915_v56, %v1863_v58  ;;  %2562 = vrcp.f32 %v1930_v60  ;;  %vm1940_vm10 = vmor %vm1938_vm8, %vm1939_vm7  ;;  %v1958_v20 = vand.u32 2147483648, %v1930_v60  ;;  %v1956_v15 = vand.u32 2147483647, %v1930_v60 }
 0x628   : > { %v1935_v57 = vsub.f32 1.0, %v1934_v52  ;;  %vm1952_vm13 = vweird.f32 %v1930_v60 }
 0x629   : > { %1923 = vst.msk [vmem:[#allocation5 + $0x10] sm:$0xff] %vm1340_vm6, %v1919_v53  ;;  %v1959_v29 = vor.u32 1.1754944e-38, %v1958_v20  ;;  %vm1957_vm15 = vcmp.eq.f32.partialorder %v1956_v15, 8.507059e+37 }
 0x62a   : > { %v1936_v4 = vmul.f32 %v2561_v55, %v1935_v57 }
 0x62c   : > { %v1911_v46 = vpop.permute.xlu2 %1910  ;;  %v1896_v2 = vpop.permute.xlu1 %1895  ;;  %v1937_v25 = vadd.f32 %v2561_v55, %v1936_v4 }
 0x62d   : > { %v2563_v10 = vpop.eup %2562  ;;  %v1916_v45 = vmul.f32 %v1911_v46, %v1892_v1  ;;  %v1913_v14 = vmul.f32 %v1896_v2, %v1889_v61 }
 0x62e   : > { %v1941_v22 = vsel %vm1940_vm10, %v2561_v55, %v1937_v25  ;;  %v1948_v8 = vmul.f32 %v2563_v10, %v1930_v60  ;;  %vm1953_vm12 = vweird.f32 %v2563_v10 }
 0x62f   : > { %v1920_v23 = vadd.f32 %v1916_v45, %v1886_v17  ;;  %v1917_v27 = vadd.f32 %v1913_v14, %v1817_v18  ;;  %v1946_v28 = vsel %vm1943_vm11, %v1945_v16, %v1941_v22  ;;  %vm1954_vm14 = vmor %vm1952_vm13, %vm1953_vm12 }
 0x630   : > { %1995 = vperm.xlu2 %2534, %v1946_v28   ;;  %v1949_v13 = vsub.f32 1.0, %v1948_v8  ;;  %v1991_v50 = vld [vmem:[#allocation5 + $0x10] sm:$0xff] }
 0x631   : > { %1924 = vst.msk [vmem:[#allocation5 + $0x18] sm:$0xff] %vm1340_vm6, %v1920_v23 }
 0x632   : > { %1921 = vst.msk [vmem:[#allocation5] sm:$0xff] %vm1340_vm6, %v1917_v27  ;;  %v1950_v31 = vmul.f32 %v2563_v10, %v1949_v13 }
 0x634   : > { %v1901_v32 = vpop.permute.xlu2 %1900  ;;  %v1951_v49 = vadd.f32 %v2563_v10, %v1950_v31 }
 0x635   : > { %v1914_v47 = vmul.f32 %v1901_v32, %v1890_v30 }
 0x636   : > { %v1955_v21 = vsel %vm1954_vm14, %v2563_v10, %v1951_v49 }
 0x637   : > { %v1918_v33 = vadd.f32 %v1914_v47, %v1840_v26  ;;  %v1960_v34 = vsel %vm1957_vm15, %v1959_v29, %v1955_v21 }
 0x638   : > { %2000 = vperm.xlu2 %2534, %v1960_v34   ;;  %v1992_v38 = vld [vmem:[#allocation5 + $0x18] sm:$0xff] }
 0x639   : > { %1922 = vst.msk [vmem:[#allocation5 + $0x8] sm:$0xff] %vm1340_vm6, %v1918_v33  ;;  %v1989_v11 = vld [vmem:[#allocation5] sm:$0xff] }
 0x640   : > { %v1990_v6 = vld [vmem:[#allocation5 + $0x8] sm:$0xff] }
 0x68a   : > { %v2006_v41 = vpop.permute.xlu0 %2005  ;;  %v1996_v35 = vpop.permute.xlu2 %1995 }
 0x68b   : > { %v2015_v36 = vmul.f32 %v2006_v41, %v1991_v50  ;;  %v2013_v43 = vmul.f32 %v1996_v35, %v1989_v11 }
 0x68d   : > { %v2017_v0 = vrot.slane %v2015_v36, 4  ;;  %v2019_v24 = vrot.slane %v2013_v43, 4 }
 0x68f   : > { %v2018_v37 = vsel %vm876_vm5, %v2017_v0, %v2013_v43  ;;  %v2020_v42 = vsel %vm876_vm5, %v2015_v36, %v2019_v24 }
 0x690   : > { %v2024_v12 = vperm.slane %v2018_v37, %v2951_v51  ;;  %v2028_v48 = vperm.slane %v2020_v42, %v2951_v51 }
 0x692   : > { %v2011_v39 = vpop.permute.xlu1 %2010  ;;  %v2001_v40 = vpop.permute.xlu2 %2000  ;;  %v2043_v19 = vrot.slane %v2024_v12, 4  ;;  %v2055_v55 = vrot.slane %v2028_v48, 4 }
 0x693   : > { %v2016_v59 = vmul.f32 %v2011_v39, %v1992_v38  ;;  %v2014_v63 = vmul.f32 %v2001_v40, %v1990_v6  ;;  %v2145_v39 = vld [vmem:[%s3437_s10 + $0x10] sm:$0xff]  ;;  %v2144_v6 = vld [vmem:[%s3437_s10 + $0x8] sm:$0xff]  ;;  %v2143_v40 = vld [vmem:[%s3437_s10] sm:$0xff] }
 0x695   : > { %v2029_v54 = vrot.slane %v2016_v59, 4  ;;  %v2031_v44 = vrot.slane %v2014_v63, 4 }
 0x697   : > { %v2030_v3 = vsel %vm876_vm5, %v2029_v54, %v2014_v63  ;;  %v2032_v9 = vsel %vm876_vm5, %v2016_v59, %v2031_v44 }
 0x698   : > { %v2036_v56 = vperm.slane %v2030_v3, %v2951_v51  ;;  %v2040_v58 = vperm.slane %v2032_v9, %v2951_v51  ;;  %v2537_v3 = vld [vmem:[%s3474_s26] ss:$0 sm:$0xff] }
 0x69a   : > { %v2041_v52 = vrot.slane %v2036_v56, 4  ;;  %v2044_v60 = vsel %vm876_vm5, %v2036_v56, %v2043_v19  ;;  %v2053_v53 = vrot.slane %v2040_v58, 4  ;;  %v2056_v57 = vsel %vm876_vm5, %v2040_v58, %v2055_v55  ;;  %v2174_v19 = vld [vmem:[%s2837_s21] sm:$0xff] }
 0x69b   : > { %v2052_v62 = vperm.slane %v2044_v60, %v2964_v5  ;;  %v2064_v1 = vperm.slane %v2056_v57, %v2964_v5 }
 0x69c   : > { %v2042_v61 = vsel %vm876_vm5, %v2041_v52, %v2024_v12  ;;  %v2054_v4 = vsel %vm876_vm5, %v2053_v53, %v2028_v48  ;;  %v2681_v52 = vmov 32.0  }
 0x69d   : > { %v2048_v7 = vperm.slane %v2042_v61, %v2964_v5  ;;  %v2060_v46 = vperm.slane %v2054_v4, %v2964_v5  ;;  %v2067_v2 = vrot.slane %v2052_v62, 4  ;;  %v2071_v25 = vrot.slane %v2064_v1, 4 }
 0x69e   : > { %2564 = vrcp.f32 %v2681_v52 }
 0x69f   : > { %v2065_v10 = vrot.slane %v2048_v7, 4  ;;  %v2068_v45 = vsel %vm876_vm5, 0.0, %v2067_v2  ;;  %v2073_v14 = vsel %vm876_vm5, %v2067_v2, %v2048_v7  ;;  %v2069_v16 = vrot.slane %v2060_v46, 4 }
 0x6a0   : > { %v2077_v17 = vperm.slane %v2073_v14, %v2951_v51  ;;  %v2078_v18 = vrot.slane %v2068_v45, 4  ;;  %v2072_v22 = vsel %vm876_vm5, 0.0, %v2071_v25  ;;  %v2084_v8 = vsel %vm876_vm5, %v2071_v25, %v2060_v46 }
 0x6a1   : > { %v2066_v23 = vsel %vm876_vm5, 0.0, %v2065_v10  ;;  %v2070_v27 = vsel %vm876_vm5, 0.0, %v2069_v16  ;;  %v2088_v28 = vperm.slane %v2084_v8, %v2951_v51  ;;  %v2089_v13 = vrot.slane %v2072_v22, 4 }
 0x6a2   : > { %v2079_v20 = vsel %vm876_vm5, %v2078_v18, %v2066_v23  ;;  %v2097_v30 = vrot.slane %v2077_v17, 4 }
 0x6a3   : > { %v2083_v31 = vperm.slane %v2079_v20, %v2951_v51  ;;  %v2090_v15 = vsel %vm876_vm5, %v2089_v13, %v2070_v27  ;;  %v2109_v32 = vrot.slane %v2088_v28, 4  ;;  %v2538_v27 = vld [vmem:[%s3475_s12] ss:$0 sm:$0xff] }
 0x6a4   : > { %v2094_v49 = vperm.slane %v2090_v15, %v2951_v51  ;;  %v2565_v60 = vpop.eup %2564 }
 0x6a5   : > { %v2098_v47 = vsel %vm876_vm5, %v2083_v31, %v2097_v30  ;;  %v2095_v29 = vrot.slane %v2083_v31, 4  ;;  %v2180_v53 = vmul.f32 32.0, %v2565_v60 }
 0x6a6   : > { %v2106_v26 = vperm.slane %v2098_v47, %v2964_v5  ;;  %v2110_v21 = vsel %vm876_vm5, %v2094_v49, %v2109_v32  ;;  %v2107_v33 = vrot.slane %v2094_v49, 4 }
 0x6a7   : > { %v2118_v34 = vperm.slane %v2110_v21, %v2964_v5  ;;  %v2096_v41 = vsel %vm876_vm5, %v2095_v29, %v2077_v17  ;;  %v2181_v57 = vsub.f32 1.0, %v2180_v53 }
 0x6a8   : > { %v2125_v50 = vrot.slane %v2106_v26, 4  ;;  %v2102_v11 = vperm.slane %v2096_v41, %v2964_v5  ;;  %v2108_v35 = vsel %vm876_vm5, %v2107_v33, %v2088_v28 }
 0x6a9   : > { %v2123_v36 = vrot.slane %v2118_v34, 4  ;;  %v2114_v51 = vperm.slane %v2108_v35, %v2964_v5  ;;  %v2146_v5 = vld [vmem:[%s3437_s10 + $0x18] sm:$0xff]  ;;  %v2182_v62 = vmul.f32 %v2565_v60, %v2181_v57 }
 0x6aa   : > { %v2126_v43 = vsel %vm876_vm5, %v2118_v34, %v2125_v50  ;;  %v2121_v0 = vrot.slane %v2102_v11, 4  ;;  %2166 = vmatpush.msrb.mxu0 %v2146_v5 }
 0x6ab   : > { %2136 = vrot.lane.b32.xlu2 %v2126_v43, %s2678_s16  ;;  %v2124_v24 = vsel %vm876_vm5, %v2123_v36, %v2106_v26  ;;  %v2119_v37 = vrot.slane %v2114_v51, 4  ;;  %v2183_v1 = vadd.f32 %v2565_v60, %v2182_v62 }
 0x6ac   : > { %2132 = vrot.lane.b32.xlu0 %v2124_v24, %s2679_s17  ;;  %v2122_v42 = vsel %vm876_vm5, %v2114_v51, %v2121_v0  ;;  %2167 = vmatpush.msrb.mxu0 %v2145_v39  ;;  %s3476_s17 = sld [smem:[#allocation23_spill]] }
 0x6ad   : > { %2128 = vrot.lane.b32.xlu1 %v2122_v42, %s2680_s18  ;;  %v2120_v38 = vsel %vm876_vm5, %v2119_v37, %v2102_v11  ;;  %vm2141_vm5 = vcmask 195584  }
 0x6ae   : > { %2168 = vmatpush.msrb.mxu0 %v2144_v6 }
 0x6b0   : > { %2169 = vmatpush.msrb.mxu0 %v2143_v40 }
 0x6b2   : > { %v2539_v13 = vld [vmem:[%s3476_s17] ss:$0 sm:$0xff] }
 0x705   : > { %v2137_v48 = vpop.permute.xlu2 %2136 }
 0x71e   : > { %v2133_v63 = vpop.permute.xlu0 %2132 }
 0x71f   : > { %v2129_v59 = vpop.permute.xlu1 %2128 }
 0x720   : > { %v2139_v12 = vsel %vm1340_vm6, %v2120_v38, %v2129_v59  ;;  %vm2184_vm6 = vweird.f32 %v2565_v60 }
 0x721   : > { %v2140_v54 = vsel %vm1707_vm9, %v2139_v12, %v2133_v63  ;;  %v2185_v61 = vsel %vm2184_vm6, %v2565_v60, %v2183_v1 }
 0x722   : > { %v2142_v44 = vsel %vm2141_vm5, %v2140_v54, %v2137_v48 }
 0x723   : > { %2402 = vmatmul.msk.f32.vlgmr.msrb.gmra.mxu0 %vm788_vm4, %v2142_v44 }
 0x7a0   : > { %v2171_v9 = vpop.f32.mrf.mxu0 }
 0x7a1   : > { %v2172_v55 = vadd.f32 %v2537_v3, %v2171_v9 }
 0x7a3   : > { %v2175_v56 = vadd.f32 %v2174_v19, %v2172_v55 }
 0x7a5   : > { %v2176_v58 = vsel %vm788_vm4, %v2175_v56, 0.0 }
 0x7a6   : > { %2177 = vadd.xlane.f32.xlu1 %v2176_v58 }
 0x819   : > { %v2178_v4 = vpop.xlane.xlu1 %2177 }
 0x81a   : > { %v2186_v7 = vmul.f32 %v2185_v61, %v2178_v4 }
 0x81c   : > { %v2187_v46 = vsub.f32 %v2175_v56, %v2186_v7 }
 0x81e   : > { %v2188_v2 = vmul.f32 %v2187_v46, %v2187_v46 }
 0x820   : > { %v2189_v25 = vsel %vm788_vm4, %v2188_v2, 0.0 }
 0x821   : > { %2190 = vadd.xlane.f32.xlu0 %v2189_v25 }
 0x894   : > { %v2191_v10 = vpop.xlane.xlu0 %2190 }
 0x895   : > { %v2192_v45 = vmul.f32 %v2191_v10, %v2185_v61 }
 0x897   : > { %v2193_v14 = vadd.f32 1e-05, %v2192_v45 }
 0x899   : > { %2566 = vrsqrt.f32 %v2193_v14  ;;  %vm2200_vm0 = vweird.f32 %v2193_v14 }
 0x89f   : > { %v2567_v16 = vpop.eup %2566 }
 0x8a0   : > { %v2195_v17 = vmul.f32 %v2567_v16, %v2193_v14  ;;  %vm2201_vm9 = vweird.f32 %v2567_v16 }
 0x8a1   : > { %vm2202_vm1 = vmor %vm2200_vm0, %vm2201_vm9 }
 0x8a2   : > { %v2196_v18 = vmul.f32 %v2567_v16, %v2195_v17 }
 0x8a4   : > { %v2197_v22 = vmul.f32 0.5, %v2196_v18 }
 0x8a6   : > { %v2198_v8 = vsub.f32 1.5, %v2197_v22 }
 0x8a8   : > { %v2199_v23 = vmul.f32 %v2567_v16, %v2198_v8 }
 0x8aa   : > { %v2203_v28 = vsel %vm2202_vm1, %v2567_v16, %v2199_v23 }
 0x8ab   : > { %v2204_v20 = vmul.f32 %v2203_v28, %v2187_v46 }
 0x8ad   : > { %v2209_v30 = vmul.f32 %v2538_v27, %v2204_v20 }
 0x8af   : > { %v2214_v31 = vadd.f32 %v2539_v13, %v2209_v30 }
 0x8b1   : > { %2215 = vst.msk [vmem:[%s560_s11] sm:$0xff] %vm788_vm4, %v2214_v31 }
 0x8b2 PF: > { %s3477_s18 = sld [smem:[#allocation12_spill]]  ;;  %s2230_s29 = sshll.u32 %s560_s11, 4  ;;  %s2231_s29 = int_to_ptr.vmem [resolvable:$true] %s2230_s29 }
 0x8b3   : > { %s3478_s24 = sld [smem:[#allocation10_spill]] }
 0x8b4   : > { %s3480_s19 = sld [smem:[#allocation24_spill]] }
 0x8b8   : > { %s2404_s25 = sshll.u32 %s3477_s18, 3 }
 0x8b9   : > { %s3482_s26 = sand.u32 1, %s3478_s24  }
 0x8ba   : > { %s3481_s28 = smov %s3480_s19  ;;  %s2228_s14 = scalar_lea.hbm %s3480_s19, %s2404_s25 }
 0x8bb   : > { %s2232_s13 = sshll.u32 %s2228_s14, 4  ;;  %s2217_s21 = scalar_lea.sflag [#allocation7], %s3482_s26  ;;  %s2233_s13 = int_to_ptr.hbm [resolvable:$true] %s2232_s13 }
 0x8bc   : > { %s2582_s30 = sshra.s32 %s2233_s13, 4  ;;  %s2588_s17 = scalar_lea.hbm %s3481_s28, 16  ;;  %s2583_s30 = int_to_ptr.hbm [resolvable:$true] %s2582_s30 }
 0x8bd   : > { %s2584_s12 = scalar_lea.hbm %s2583_s30, 8  ;;  %p2589_p7 = scmp.lt.s32.totalorder %s2583_s30, %s3481_s28 }
 0x8be   : > { %p2585_p4 = scmp.ne.s32.totalorder %s2583_s30, %s2584_s12  ;;  %p2590_p8 = scmp.lt.s32.totalorder %s2588_s17, %s2584_s12 }
 0x8c0   : > { %p2586_p5 = pnand %p2585_p4, %p2806_p3  ;;  %p2591_p10 = por %p2590_p8, %p2589_p7 }
 0x8c2   : > { %p2587_p6 = pneg %p2586_p5 }
 0x8c4   : > { %p2592_p11 = pnand %p2591_p10, %p2587_p6 }
 0x8c6   : > { %2595 = shalt.err (!%p2592_p11)
}
 0x8c7   : > { %2408 = dma.vmem_to_hbm [thread:$0]  (%p2806_p3), %s2231_s29, 128, %s2233_s13, %s2217_s21  }
 0x8c8 PF: > { %s3483_s11 = sld [smem:[#allocation15_spill]] }
 0x8c9   : > { %s3484_s23 = sld [smem:[#allocation9_spill]] }
 0x8ce   : > { %p2414_p12 = scmp.ge.s32.totalorder %s3483_s11, 2 }
 0x8cf   : > { %s2244_s22 = sand.u32 1, %s3484_s23  }
 0x8d0   : > { %p2411_p13 = pnand %p2414_p12, %p2816_p9  ;;  %s2245_s27 = scalar_lea.sflag [#allocation7], %s2244_s22 }
 0x8d2   : > { %p2412_p0 = pneg %p2411_p13 }
 0x8d4   : > { %2629 = dma.done.wait (%p2412_p0), %s2245_s27, 128  }
 0x8d5   : > { %2631 = vsyncadd (%p2412_p0), %s2245_s27, 4294967168  ;;  %s27_s20 = sadd.s32 1, %s3483_s11   ;;  %s3486_s29 = sld [smem:[#allocation10_spill]] }
 0x8d6   : > { %p24_p1 = scmp.ge.s32.totalorder %s27_s20, 8   ;;  %s3487_s30 = sld [smem:[#allocation11_spill]] }
 0x8d7   : > { %s3488_s15 = sld [smem:[#allocation20_spill]] }
 0x8d8   : > { %s3489_s16 = sld [smem:[#allocation13_spill]]  ;;  %26 = sbr.rel (!%p24_p1) target bundleno = 10 (0xa), region = 132 }
 0x8d9   : > { %s3490_s17 = sld [smem:[#allocation14_spill]] }
 0x8da   : > { %s3491_s18 = sld [smem:[#allocation16_spill]] }
 0x8db   : > { %s3492_s19 = sld [smem:[#allocation18_spill]] }
 0x8dd   :  { %2251 = vsyncpa [#allocation7], 1 }
 0x8de   :  { %2253 = vsyncpa [#allocation7 + $0x1], 1 }

</bundles_post_ra>
